<compile_context>
chip_gen: v6e
topology: v6e:2x2x1
jax: 0.10.0
libtpu: 0.0.40
codegen_flags: <defaults>
</compile_context>

<pallas_src>
import functools
import math

import jax
import jax.numpy as jnp
from jax import lax
from jax.experimental import pallas as pl
from jax.experimental.pallas import tpu as pltpu


_MXU_DTYPE = jnp.bfloat16          # MXU operand dtype; accumulation stays f32.
_SINGLE_BUFFER_WEIGHTS = True      # auto-falls back if Buffered(1) unsupported.


# ----------------------------- in-kernel helpers ---------------------------

def _layer_norm(x, gamma, beta, eps):
    mean = jnp.mean(x, axis=-1, keepdims=True)
    c = x - mean
    var = jnp.mean(c * c, axis=-1, keepdims=True)
    return c * lax.rsqrt(var + eps) * gamma + beta


def _gelu(x):
    # TODO(synk): HF "gelu" default is the exact erf form; tanh approximation
    # is used here (and in the reference) for guaranteed Mosaic lowering.
    return jax.nn.gelu(x, approximate=True)


# ------------------------------- Pallas kernel -----------------------------

def _akt_layer_kernel(hsq_ref, hskv_ref, tcol_ref, trow_ref, pb_ref, mask_ref,
                      wq_ref, bq_ref, wk_ref, bk_ref, wv_ref, bv_ref,
                      wo_ref, bo_ref, g1_ref, beta1_ref,
                      wi_ref, bi_ref, wf_ref, bf_ref, g2_ref, beta2_ref,
                      o_ref, ctx_ref, *, num_heads, head_dim, eps, alpha,
                      use_timestamp):
    # hsq_ref  : [1, TQ, H]  hidden states, query rows of this tile (f32)
    # hskv_ref : [1, S,  H]  hidden states, key/value rows (full sequence, f32)
    # tcol_ref : [1, TQ, 1]  timestamps of the query rows (int32, ms)
    # trow_ref : [1, 1,  S]  timestamps of the key rows (int32, ms)
    # pb_ref   : [nH, TQ, S] position bias slab for this query tile (f32)
    # mask_ref : [1, 1,  S]  additive attention mask (0 / -10000, f32)
    # w*_ref   : matmul weights [in, out] in bf16; biases/LN params [1, out] f32
    xq = hsq_ref[0]                                      # [TQ, H] f32
    xkv = hskv_ref[0]                                    # [S,  H] f32

    xq_b = xq.astype(_MXU_DTYPE)
    xkv_b = xkv.astype(_MXU_DTYPE)

    q = jnp.dot(xq_b, wq_ref[...], preferred_element_type=jnp.float32) + bq_ref[...]
    k = jnp.dot(xkv_b, wk_ref[...], preferred_element_type=jnp.float32) + bk_ref[...]
    v = jnp.dot(xkv_b, wv_ref[...], preferred_element_type=jnp.float32) + bv_ref[...]
    q_b = q.astype(_MXU_DTYPE)
    k_b = k.astype(_MXU_DTYPE)
    v_b = v.astype(_MXU_DTYPE)

    # Lag-time attention scale, hoisted out of the per-head loop; its
    # reciprocal runs on the EUP so the loop only multiplies.
    if use_timestamp:
        lag = ((tcol_ref[0] - trow_ref[0]).astype(jnp.float32)
               * (1.0 / 60000.0))                         # [TQ, S]
        scale = (math.sqrt(head_dim)
                 - alpha / (jnp.maximum(lag, 0.0) + 1.0) + alpha)
        inv_scale = pl.reciprocal(scale, approx=True)     # [TQ, S]
    else:
        inv_scale = jnp.float32(1.0 / math.sqrt(head_dim))

    mask = mask_ref[0]                                    # [1, S] additive

    # Per-head attention.  Each head's context is written into the ctx VMEM
    # scratch at its column slice so the output projection below is a single
    # full-contraction-depth MXU matmul (no per-head K = dh accumulation chain).
    for h in range(num_heads):
        lo, hi = h * head_dim, (h + 1) * head_dim
        s = lax.dot_general(q_b[:, lo:hi], k_b[:, lo:hi],
                            (((1,), (1,)), ((), ())),
                            preferred_element_type=jnp.float32)   # [TQ, S]
        s = s * inv_scale + pb_ref[h] + mask
        s = s - jnp.max(s, axis=-1, keepdims=True)
        p = jnp.exp(s)
        denom = jnp.sum(p, axis=-1, keepdims=True)
        p = p * pl.reciprocal(denom, approx=True)
        ctx_ref[:, lo:hi] = jnp.dot(p.astype(_MXU_DTYPE), v_b[:, lo:hi],
                                    preferred_element_type=jnp.float32)

    attn = jnp.dot(ctx_ref[...].astype(_MXU_DTYPE), wo_ref[...],
                   preferred_element_type=jnp.float32) + bo_ref[...]
    h1 = _layer_norm(attn + xq, g1_ref[...], beta1_ref[...], eps)

    inter = _gelu(jnp.dot(h1.astype(_MXU_DTYPE), wi_ref[...],
                          preferred_element_type=jnp.float32) + bi_ref[...])
    ffn = jnp.dot(inter.astype(_MXU_DTYPE), wf_ref[...],
                  preferred_element_type=jnp.float32) + bf_ref[...]
    h2 = _layer_norm(ffn + h1, g2_ref[...], beta2_ref[...], eps)

    o_ref[0] = h2.astype(o_ref.dtype)


# ------------------------------ layer wrapper ------------------------------

def akt_layer_forward(hs, timestamp, position_bias, attn_mask_add, p, cfg):
    """One fused AktLayer forward.  hs: [B, S, H] f32 -> [B, S, H] f32."""
    global _SINGLE_BUFFER_WEIGHTS

    B, S, H = hs.shape
    nH = cfg.num_attention_heads
    dh = H // nH
    I = cfg.intermediate_size

    # Query-tile size: full sequence for small S, 256-row tiles otherwise.
    tq = 256 if (S > 256 and S % 256 == 0) else S
    n_qt = S // tq

    use_timestamp = timestamp is not None
    ts = (timestamp.astype(jnp.int32) if use_timestamp
          else jnp.zeros((B, S), jnp.int32))
    tcol = ts.reshape(B, S, 1)
    trow = ts.reshape(B, 1, S)

    if attn_mask_add is None:
        attn_mask_add = jnp.zeros((B, 1, S), jnp.float32)
    if position_bias is None:
        position_bias = jnp.zeros((nH, S, S), jnp.float32)

    # Matmul weights streamed as bf16; biases / LN params stay f32.
    wq = p["wq"].astype(_MXU_DTYPE)
    wk = p["wk"].astype(_MXU_DTYPE)
    wv = p["wv"].astype(_MXU_DTYPE)
    wo = p["wo"].astype(_MXU_DTYPE)
    wi = p["wi"].astype(_MXU_DTYPE)
    wf = p["wf"].astype(_MXU_DTYPE)
    bq = p["bq"].reshape(1, H)
    bk = p["bk"].reshape(1, H)
    bv = p["bv"].reshape(1, H)
    bo = p["bo"].reshape(1, H)
    g1 = p["g1"].reshape(1, H)
    b1 = p["b1"].reshape(1, H)
    bi = p["bi"].reshape(1, I)
    bf = p["bf"].reshape(1, H)
    g2 = p["g2"].reshape(1, H)
    b2 = p["b2"].reshape(1, H)

    operands = (hs, hs, tcol, trow, position_bias, attn_mask_add,
                wq, bq, wk, bk, wv, bv, wo, bo, g1, b1,
                wi, bi, wf, bf, g2, b2)

    kernel = functools.partial(
        _akt_layer_kernel, num_heads=nH, head_dim=dh,
        eps=cfg.layer_norm_eps, alpha=cfg.lag_time_scale_alpha,
        use_timestamp=use_timestamp)

    flops = int(2 * B * S * H * H * 4        # q, k, v, output projections
                + 2 * B * S * S * H * 2      # scores + context (all heads)
                + 2 * B * S * H * I * 2)     # FFN in + out
    transcendentals = int(B * nH * S * S + B * S * I)
    bytes_accessed = int(sum(a.size * a.dtype.itemsize for a in operands)
                         + B * S * H * 4)

    def run(weight_mode):
        qmap = lambda b, qi: (b, qi, 0)       # blocked on the query tile
        bmap = lambda b, qi: (b, 0, 0)        # batch-only blocking
        if weight_mode is None:
            wspec = lambda shape: pl.BlockSpec(shape, lambda b, qi: (0, 0))
        else:
            wspec = lambda shape: pl.BlockSpec(shape, lambda b, qi: (0, 0),
                                               pipeline_mode=weight_mode)

        grid_spec = pltpu.PrefetchScalarGridSpec(
            num_scalar_prefetch=0,
            grid=(B, n_qt),
            in_specs=[
                pl.BlockSpec((1, tq, H), qmap),                    # hs (query rows)
                pl.BlockSpec((1, S, H), bmap),                     # hs (key/value rows)
                pl.BlockSpec((1, tq, 1), qmap),                    # timestamps (query rows)
                pl.BlockSpec((1, 1, S), bmap),                     # timestamps (key row)
                pl.BlockSpec((nH, tq, S), lambda b, qi: (0, qi, 0)),  # position bias slab
                pl.BlockSpec((1, 1, S), bmap),                     # additive mask
                wspec((H, H)), wspec((1, H)),                      # Wq, bq
                wspec((H, H)), wspec((1, H)),                      # Wk, bk
                wspec((H, H)), wspec((1, H)),                      # Wv, bv
                wspec((H, H)), wspec((1, H)),                      # Wo, bo
                wspec((1, H)), wspec((1, H)),                      # LN1 gamma, beta
                wspec((H, I)), wspec((1, I)),                      # W intermediate, b
                wspec((I, H)), wspec((1, H)),                      # W ffn-out, b
                wspec((1, H)), wspec((1, H)),                      # LN2 gamma, beta
            ],
            out_specs=pl.BlockSpec((1, tq, H), qmap),
            scratch_shapes=[pltpu.VMEM((tq, H), jnp.float32)],     # ctx (all heads)
        )
        return pl.pallas_call(
            kernel,
            out_shape=jax.ShapeDtypeStruct((B, S, H), jnp.float32),
            grid_spec=grid_spec,
            compiler_params=pltpu.CompilerParams(
                dimension_semantics=("parallel", "parallel"),
                vmem_limit_bytes=32 * 1024 * 1024),
            cost_estimate=pl.CostEstimate(
                flops=flops, transcendentals=transcendentals,
                bytes_accessed=bytes_accessed),
        )(*operands)

    if _SINGLE_BUFFER_WEIGHTS:
        try:
            # Grid-invariant weights need only one VMEM buffer (no prefetch).
            return run(pl.Buffered(1))
        except Exception:
            _SINGLE_BUFFER_WEIGHTS = False   # this JAX build rejects Buffered(1)
    return run(None)


def akt_encoder_apply(params, query_states, attn_mask_add, position_bias,
                      timestamp, cfg):
    # TODO(synk): at toy shapes, fusing all layers into one pallas_call would
    # remove per-call overhead; kept per-layer for the general (large-H) case.
    hs = query_states
    for layer_params in params:
        hs = akt_layer_forward(hs, timestamp, position_bias, attn_mask_add,
                               layer_params, cfg)
    return hs


# --------------------------------- config ----------------------------------

class Config:
    hidden_size = 32
    num_attention_heads = 2
    intermediate_size = 64
    num_hidden_layers = 2
    layer_norm_eps = 1e-12
    lag_time_scale_alpha = 1.0
    is_decoder = False
    add_cross_attention = False


def _linear_init(key, fan_in, fan_out):
    kw, kb = jax.random.split(key)
    bound = 1.0 / math.sqrt(fan_in)
    w = jax.random.uniform(kw, (fan_in, fan_out), jnp.float32, -bound, bound)
    b = jax.random.uniform(kb, (fan_out,), jnp.float32, -bound, bound)
    return w, b


def init_params(key, cfg):
    H, I = cfg.hidden_size, cfg.intermediate_size
    layers = []
    for lk in jax.random.split(key, cfg.num_hidden_layers):
        k = jax.random.split(lk, 6)
        wq, bq = _linear_init(k[0], H, H)
        wk, bk = _linear_init(k[1], H, H)
        wv, bv = _linear_init(k[2], H, H)
        wo, bo = _linear_init(k[3], H, H)
        wi, bi = _linear_init(k[4], H, I)
        wf, bf = _linear_init(k[5], I, H)
        layers.append(dict(
            wq=wq, bq=bq, wk=wk, bk=bk, wv=wv, bv=bv, wo=wo, bo=bo,
            g1=jnp.ones((H,), jnp.float32), b1=jnp.zeros((H,), jnp.float32),
            wi=wi, bi=bi, wf=wf, bf=bf,
            g2=jnp.ones((H,), jnp.float32), b2=jnp.zeros((H,), jnp.float32)))
    return layers


# -------------------------------- reference --------------------------------
# Pure-JAX reference; matmul operands are cast to bf16 (f32 accumulation) to
# mirror the kernel's MXU precision so the comparison isolates kernel logic.

def _layer_norm_ref(x, g, b, eps):
    mean = jnp.mean(x, axis=-1, keepdims=True)
    var = jnp.mean((x - mean) ** 2, axis=-1, keepdims=True)
    return (x - mean) / jnp.sqrt(var + eps) * g + b


def _mm(a, w):
    return jnp.dot(a.astype(_MXU_DTYPE), w.astype(_MXU_DTYPE),
                   preferred_element_type=jnp.float32)


def reference(params, hs, attn_mask_add, position_bias, timestamp, cfg):
    B, S, H = hs.shape
    nH = cfg.num_attention_heads
    dh = H // nH
    x = hs
    for p in params:
        q = (_mm(x, p["wq"]) + p["bq"]).reshape(B, S, nH, dh).transpose(0, 2, 1, 3)
        k = (_mm(x, p["wk"]) + p["bk"]).reshape(B, S, nH, dh).transpose(0, 2, 1, 3)
        v = (_mm(x, p["wv"]) + p["bv"]).reshape(B, S, nH, dh).transpose(0, 2, 1, 3)
        scores = jnp.einsum("bhqd,bhkd->bhqk",
                            q.astype(_MXU_DTYPE), k.astype(_MXU_DTYPE),
                            preferred_element_type=jnp.float32)
        if timestamp is not None:
            ts = timestamp.astype(jnp.int32)
            lag = (ts[:, None, :, None] - ts[:, None, None, :]).astype(
                jnp.float32) / 60000.0
            scale = (math.sqrt(dh)
                     - cfg.lag_time_scale_alpha / (jnp.maximum(lag, 0.0) + 1.0)
                     + cfg.lag_time_scale_alpha)
        else:
            scale = math.sqrt(dh)
        scores = scores / scale
        scores = scores + position_bias[None]
        scores = scores + attn_mask_add[:, :, None, :]
        probs = jax.nn.softmax(scores, axis=-1)
        ctx = jnp.einsum("bhqk,bhkd->bhqd",
                         probs.astype(_MXU_DTYPE), v.astype(_MXU_DTYPE),
                         preferred_element_type=jnp.float32)
        ctx = ctx.transpose(0, 2, 1, 3).reshape(B, S, H)
        attn_out = _mm(ctx, p["wo"]) + p["bo"]
        h1 = _layer_norm_ref(attn_out + x, p["g1"], p["b1"], cfg.layer_norm_eps)
        inter = jax.nn.gelu(_mm(h1, p["wi"]) + p["bi"], approximate=True)
        ffn = _mm(inter, p["wf"]) + p["bf"]
        x = _layer_norm_ref(ffn + h1, p["g2"], p["b2"], cfg.layer_norm_eps)
    return x


# ----------------------------------- main -----------------------------------

if __name__ == "__main__":
    cfg = Config()
    key = jax.random.PRNGKey(0)
    kp, kh, kt, kpb = jax.random.split(key, 4)

    params = init_params(kp, cfg)

    B, S = 2, 8
    H = cfg.hidden_size

    query_states = jax.random.normal(kh, (B, S, H), jnp.float32)

    # Millisecond timestamps, increasing along the sequence.
    deltas = jax.random.randint(kt, (B, S), 0, 120000, jnp.int32)
    timestamp = jnp.cumsum(deltas, axis=1)

    position_bias = 0.1 * jax.random.normal(
        kpb, (cfg.num_attention_heads, S, S), jnp.float32)

    # Additive attention mask (HF convention: 0 valid, -10000 masked).
    lengths = jnp.array([S, S - 2], jnp.int32)
    pos = jnp.arange(S)[None, :]
    attn_mask_add = jnp.where(pos < lengths[:, None], 0.0, -10000.0)
    attn_mask_add = attn_mask_add.astype(jnp.float32).reshape(B, 1, S)

    out = akt_encoder_apply(params, query_states, attn_mask_add,
                            position_bias, timestamp, cfg)
    out = jax.block_until_ready(out)

    ref = reference(params, query_states, attn_mask_add, position_bias,
                    timestamp, cfg)
    assert out.shape == (B, S, H)
    max_diff = float(jnp.max(jnp.abs(out - ref)))
    # Tolerance covers approx EUP reciprocals + MXU vs XLA bf16 accumulation
    # order differences (both sides use bf16 matmul operands, f32 accumulate).
    assert max_diff < 2e-2, f"max abs diff {max_diff}"

    print("KERNEL_OK")
</pallas_src>

<mosaic_0001>
module attributes {stable_mosaic.version = 11 : i64} {
  func.func @_akt_layer_kernel(%arg0: i32, %arg1: i32, %arg2: memref<1x8x32xf32, #tpu.memory_space<vmem>>, %arg3: memref<1x8x32xf32, #tpu.memory_space<vmem>>, %arg4: memref<1x8x1xi32, #tpu.memory_space<vmem>>, %arg5: memref<1x1x8xi32, #tpu.memory_space<vmem>>, %arg6: memref<2x8x8xf32, #tpu.memory_space<vmem>>, %arg7: memref<1x1x8xf32, #tpu.memory_space<vmem>>, %arg8: memref<32x32xbf16, #tpu.memory_space<vmem>>, %arg9: memref<1x32xf32, #tpu.memory_space<vmem>>, %arg10: memref<32x32xbf16, #tpu.memory_space<vmem>>, %arg11: memref<1x32xf32, #tpu.memory_space<vmem>>, %arg12: memref<32x32xbf16, #tpu.memory_space<vmem>>, %arg13: memref<1x32xf32, #tpu.memory_space<vmem>>, %arg14: memref<32x32xbf16, #tpu.memory_space<vmem>>, %arg15: memref<1x32xf32, #tpu.memory_space<vmem>>, %arg16: memref<1x32xf32, #tpu.memory_space<vmem>>, %arg17: memref<1x32xf32, #tpu.memory_space<vmem>>, %arg18: memref<32x64xbf16, #tpu.memory_space<vmem>>, %arg19: memref<1x64xf32, #tpu.memory_space<vmem>>, %arg20: memref<64x32xbf16, #tpu.memory_space<vmem>>, %arg21: memref<1x32xf32, #tpu.memory_space<vmem>>, %arg22: memref<1x32xf32, #tpu.memory_space<vmem>>, %arg23: memref<1x32xf32, #tpu.memory_space<vmem>>, %arg24: memref<1x8x32xf32, #tpu.memory_space<vmem>>, %arg25: memref<8x32xf32, #tpu.memory_space<vmem>>) attributes {dimension_semantics = [#tpu.dimension_semantics<parallel>, #tpu.dimension_semantics<parallel>], iteration_bounds = array<i64: 2, 1>, scalar_prefetch = 0 : i64, scratch_operands = 1 : i64, tpu.core_type = #tpu.core_type<tc>, window_params = [{transform_indices = @transform_0, window_bounds = array<i64: 1, 8, 32>}, {transform_indices = @transform_1, window_bounds = array<i64: 1, 8, 32>}, {transform_indices = @transform_2, window_bounds = array<i64: 1, 8, 1>}, {transform_indices = @transform_3, window_bounds = array<i64: 1, 1, 8>}, {transform_indices = @transform_4, window_bounds = array<i64: 2, 8, 8>}, {transform_indices = @transform_5, window_bounds = array<i64: 1, 1, 8>}, {pipeline_mode = #tpu.pipeline_mode<synchronous>, transform_indices = @transform_6, window_bounds = array<i64: 32, 32>}, {pipeline_mode = #tpu.pipeline_mode<synchronous>, transform_indices = @transform_7, window_bounds = array<i64: 1, 32>}, {pipeline_mode = #tpu.pipeline_mode<synchronous>, transform_indices = @transform_8, window_bounds = array<i64: 32, 32>}, {pipeline_mode = #tpu.pipeline_mode<synchronous>, transform_indices = @transform_9, window_bounds = array<i64: 1, 32>}, {pipeline_mode = #tpu.pipeline_mode<synchronous>, transform_indices = @transform_10, window_bounds = array<i64: 32, 32>}, {pipeline_mode = #tpu.pipeline_mode<synchronous>, transform_indices = @transform_11, window_bounds = array<i64: 1, 32>}, {pipeline_mode = #tpu.pipeline_mode<synchronous>, transform_indices = @transform_12, window_bounds = array<i64: 32, 32>}, {pipeline_mode = #tpu.pipeline_mode<synchronous>, transform_indices = @transform_13, window_bounds = array<i64: 1, 32>}, {pipeline_mode = #tpu.pipeline_mode<synchronous>, transform_indices = @transform_14, window_bounds = array<i64: 1, 32>}, {pipeline_mode = #tpu.pipeline_mode<synchronous>, transform_indices = @transform_15, window_bounds = array<i64: 1, 32>}, {pipeline_mode = #tpu.pipeline_mode<synchronous>, transform_indices = @transform_16, window_bounds = array<i64: 32, 64>}, {pipeline_mode = #tpu.pipeline_mode<synchronous>, transform_indices = @transform_17, window_bounds = array<i64: 1, 64>}, {pipeline_mode = #tpu.pipeline_mode<synchronous>, transform_indices = @transform_18, window_bounds = array<i64: 64, 32>}, {pipeline_mode = #tpu.pipeline_mode<synchronous>, transform_indices = @transform_19, window_bounds = array<i64: 1, 32>}, {pipeline_mode = #tpu.pipeline_mode<synchronous>, transform_indices = @transform_20, window_bounds = array<i64: 1, 32>}, {pipeline_mode = #tpu.pipeline_mode<synchronous>, transform_indices = @transform_21, window_bounds = array<i64: 1, 32>}, {transform_indices = @transform_22, window_bounds = array<i64: 1, 8, 32>}]} {
    %c0 = arith.constant 0 : index
    %c0_0 = arith.constant 0 : index
    %c0_1 = arith.constant 0 : index
    %0 = vector.load %arg2[%c0, %c0_0, %c0_1] : memref<1x8x32xf32, #tpu.memory_space<vmem>>, vector<1x8x32xf32>
    %1 = vector.shape_cast %0 : vector<1x8x32xf32> to vector<8x32xf32>
    %c0_2 = arith.constant 0 : index
    %c0_3 = arith.constant 0 : index
    %c0_4 = arith.constant 0 : index
    %2 = vector.load %arg3[%c0_2, %c0_3, %c0_4] : memref<1x8x32xf32, #tpu.memory_space<vmem>>, vector<1x8x32xf32>
    %3 = vector.shape_cast %2 : vector<1x8x32xf32> to vector<8x32xf32>
    %4 = arith.truncf %1 : vector<8x32xf32> to vector<8x32xbf16>
    %5 = arith.truncf %3 : vector<8x32xf32> to vector<8x32xbf16>
    %c0_5 = arith.constant 0 : index
    %c0_6 = arith.constant 0 : index
    %6 = vector.load %arg8[%c0_5, %c0_6] : memref<32x32xbf16, #tpu.memory_space<vmem>>, vector<32x32xbf16>
    %cst = arith.constant dense<0.000000e+00> : vector<8x32xf32>
    %7 = tpu.matmul %4, %6, %cst {dimension_numbers = #tpu.dot_dimension_numbers<[1], [0], [0], [1], [0, 0, 1, 1], [], []>} : vector<8x32xbf16>, vector<32x32xbf16>, vector<8x32xf32> -> vector<8x32xf32>
    %c0_7 = arith.constant 0 : index
    %c0_8 = arith.constant 0 : index
    %8 = vector.load %arg9[%c0_7, %c0_8] : memref<1x32xf32, #tpu.memory_space<vmem>>, vector<1x32xf32>
    %9 = vector.broadcast %8 : vector<1x32xf32> to vector<8x32xf32>
    %10 = arith.addf %7, %9 : vector<8x32xf32>
    %c0_9 = arith.constant 0 : index
    %c0_10 = arith.constant 0 : index
    %11 = vector.load %arg10[%c0_9, %c0_10] : memref<32x32xbf16, #tpu.memory_space<vmem>>, vector<32x32xbf16>
    %cst_11 = arith.constant dense<0.000000e+00> : vector<8x32xf32>
    %12 = tpu.matmul %5, %11, %cst_11 {dimension_numbers = #tpu.dot_dimension_numbers<[1], [0], [0], [1], [0, 0, 1, 1], [], []>} : vector<8x32xbf16>, vector<32x32xbf16>, vector<8x32xf32> -> vector<8x32xf32>
    %c0_12 = arith.constant 0 : index
    %c0_13 = arith.constant 0 : index
    %13 = vector.load %arg11[%c0_12, %c0_13] : memref<1x32xf32, #tpu.memory_space<vmem>>, vector<1x32xf32>
    %14 = vector.broadcast %13 : vector<1x32xf32> to vector<8x32xf32>
    %15 = arith.addf %12, %14 : vector<8x32xf32>
    %c0_14 = arith.constant 0 : index
    %c0_15 = arith.constant 0 : index
    %16 = vector.load %arg12[%c0_14, %c0_15] : memref<32x32xbf16, #tpu.memory_space<vmem>>, vector<32x32xbf16>
    %cst_16 = arith.constant dense<0.000000e+00> : vector<8x32xf32>
    %17 = tpu.matmul %5, %16, %cst_16 {dimension_numbers = #tpu.dot_dimension_numbers<[1], [0], [0], [1], [0, 0, 1, 1], [], []>} : vector<8x32xbf16>, vector<32x32xbf16>, vector<8x32xf32> -> vector<8x32xf32>
    %c0_17 = arith.constant 0 : index
    %c0_18 = arith.constant 0 : index
    %18 = vector.load %arg13[%c0_17, %c0_18] : memref<1x32xf32, #tpu.memory_space<vmem>>, vector<1x32xf32>
    %19 = vector.broadcast %18 : vector<1x32xf32> to vector<8x32xf32>
    %20 = arith.addf %17, %19 : vector<8x32xf32>
    %21 = arith.truncf %10 : vector<8x32xf32> to vector<8x32xbf16>
    %22 = arith.truncf %15 : vector<8x32xf32> to vector<8x32xbf16>
    %23 = arith.truncf %20 : vector<8x32xf32> to vector<8x32xbf16>
    %c0_19 = arith.constant 0 : index
    %c0_20 = arith.constant 0 : index
    %c0_21 = arith.constant 0 : index
    %24 = vector.load %arg4[%c0_19, %c0_20, %c0_21] : memref<1x8x1xi32, #tpu.memory_space<vmem>>, vector<1x8x1xi32>
    %25 = vector.shape_cast %24 : vector<1x8x1xi32> to vector<8x1xi32>
    %c0_22 = arith.constant 0 : index
    %c0_23 = arith.constant 0 : index
    %c0_24 = arith.constant 0 : index
    %26 = vector.load %arg5[%c0_22, %c0_23, %c0_24] : memref<1x1x8xi32, #tpu.memory_space<vmem>>, vector<1x1x8xi32>
    %27 = vector.shape_cast %26 : vector<1x1x8xi32> to vector<1x8xi32>
    %28 = vector.broadcast %25 : vector<8x1xi32> to vector<8x8xi32>
    %29 = vector.broadcast %27 : vector<1x8xi32> to vector<8x8xi32>
    %30 = arith.subi %28, %29 : vector<8x8xi32>
    %31 = arith.sitofp %30 : vector<8x8xi32> to vector<8x8xf32>
    %cst_25 = arith.constant 1.66666669E-5 : f32
    %32 = vector.broadcast %cst_25 : f32 to vector<8x8xf32>
    %33 = arith.mulf %31, %32 : vector<8x8xf32>
    %cst_26 = arith.constant 0.000000e+00 : f32
    %34 = vector.broadcast %cst_26 : f32 to vector<8x8xf32>
    %35 = arith.maximumf %33, %34 : vector<8x8xf32>
    %cst_27 = arith.constant 1.000000e+00 : f32
    %36 = vector.broadcast %cst_27 : f32 to vector<8x8xf32>
    %37 = arith.addf %35, %36 : vector<8x8xf32>
    %cst_28 = arith.constant 1.000000e+00 : f32
    %38 = vector.broadcast %cst_28 : f32 to vector<8x8xf32>
    %39 = arith.divf %38, %37 : vector<8x8xf32>
    %cst_29 = arith.constant 4.000000e+00 : f32
    %40 = vector.broadcast %cst_29 : f32 to vector<8x8xf32>
    %41 = arith.subf %40, %39 : vector<8x8xf32>
    %cst_30 = arith.constant 1.000000e+00 : f32
    %42 = vector.broadcast %cst_30 : f32 to vector<8x8xf32>
    %43 = arith.addf %41, %42 : vector<8x8xf32>
    %44 = tpu.reciprocal %43 {approx = true} : vector<8x8xf32> -> vector<8x8xf32>
    %c0_31 = arith.constant 0 : index
    %c0_32 = arith.constant 0 : index
    %c0_33 = arith.constant 0 : index
    %45 = vector.load %arg7[%c0_31, %c0_32, %c0_33] : memref<1x1x8xf32, #tpu.memory_space<vmem>>, vector<1x1x8xf32>
    %46 = vector.shape_cast %45 : vector<1x1x8xf32> to vector<1x8xf32>
    %47 = vector.extract_strided_slice %21 {offsets = [0, 0], sizes = [8, 16], strides = [1, 1]} : vector<8x32xbf16> to vector<8x16xbf16>
    %48 = vector.extract_strided_slice %22 {offsets = [0, 0], sizes = [8, 16], strides = [1, 1]} : vector<8x32xbf16> to vector<8x16xbf16>
    %cst_34 = arith.constant dense<0.000000e+00> : vector<8x8xf32>
    %49 = tpu.matmul %47, %48, %cst_34 {dimension_numbers = #tpu.dot_dimension_numbers<[1], [1], [0], [0], [0, 0, 1, 0], [], []>} : vector<8x16xbf16>, vector<8x16xbf16>, vector<8x8xf32> -> vector<8x8xf32>
    %50 = arith.mulf %49, %44 : vector<8x8xf32>
    %c0_35 = arith.constant 0 : index
    %c0_36 = arith.constant 0 : index
    %c0_37 = arith.constant 0 : index
    %51 = vector.load %arg6[%c0_35, %c0_36, %c0_37] : memref<2x8x8xf32, #tpu.memory_space<vmem>>, vector<1x8x8xf32>
    %52 = vector.shape_cast %51 : vector<1x8x8xf32> to vector<8x8xf32>
    %53 = arith.addf %50, %52 : vector<8x8xf32>
    %54 = vector.broadcast %46 : vector<1x8xf32> to vector<8x8xf32>
    %55 = arith.addf %53, %54 : vector<8x8xf32>
    %cst_38 = arith.constant dense<0xFF800000> : vector<8xf32>
    %56 = vector.multi_reduction <maximumf>, %55, %cst_38 [1] : vector<8x8xf32> to vector<8xf32>
    %57 = vector.shape_cast %56 : vector<8xf32> to vector<8x1xf32>
    %58 = vector.broadcast %57 : vector<8x1xf32> to vector<8x8xf32>
    %59 = arith.subf %55, %58 : vector<8x8xf32>
    %60 = math.exp %59 : vector<8x8xf32>
    %cst_39 = arith.constant dense<0.000000e+00> : vector<8xf32>
    %61 = vector.multi_reduction <add>, %60, %cst_39 [1] : vector<8x8xf32> to vector<8xf32>
    %62 = vector.shape_cast %61 : vector<8xf32> to vector<8x1xf32>
    %63 = tpu.reciprocal %62 {approx = true} : vector<8x1xf32> -> vector<8x1xf32>
    %64 = vector.broadcast %63 : vector<8x1xf32> to vector<8x8xf32>
    %65 = arith.mulf %60, %64 : vector<8x8xf32>
    %66 = arith.truncf %65 : vector<8x8xf32> to vector<8x8xbf16>
    %67 = vector.extract_strided_slice %23 {offsets = [0, 0], sizes = [8, 16], strides = [1, 1]} : vector<8x32xbf16> to vector<8x16xbf16>
    %cst_40 = arith.constant dense<0.000000e+00> : vector<8x16xf32>
    %68 = tpu.matmul %66, %67, %cst_40 {dimension_numbers = #tpu.dot_dimension_numbers<[1], [0], [0], [1], [0, 0, 1, 1], [], []>} : vector<8x8xbf16>, vector<8x16xbf16>, vector<8x16xf32> -> vector<8x16xf32>
    %c0_41 = arith.constant 0 : index
    %c0_42 = arith.constant 0 : index
    %69 = vector.load %arg25[%c0_41, %c0_42] : memref<8x32xf32, #tpu.memory_space<vmem>>, vector<8x16xf32>
    tpu.vector_store %arg25[%c0_41, %c0_42], %68 {strides = array<i32>} : memref<8x32xf32, #tpu.memory_space<vmem>>, vector<8x16xf32>,
    %70 = vector.extract_strided_slice %21 {offsets = [0, 16], sizes = [8, 16], strides = [1, 1]} : vector<8x32xbf16> to vector<8x16xbf16>
    %71 = vector.extract_strided_slice %22 {offsets = [0, 16], sizes = [8, 16], strides = [1, 1]} : vector<8x32xbf16> to vector<8x16xbf16>
    %cst_43 = arith.constant dense<0.000000e+00> : vector<8x8xf32>
    %72 = tpu.matmul %70, %71, %cst_43 {dimension_numbers = #tpu.dot_dimension_numbers<[1], [1], [0], [0], [0, 0, 1, 0], [], []>} : vector<8x16xbf16>, vector<8x16xbf16>, vector<8x8xf32> -> vector<8x8xf32>
    %73 = arith.mulf %72, %44 : vector<8x8xf32>
    %c1 = arith.constant 1 : index
    %c0_44 = arith.constant 0 : index
    %c0_45 = arith.constant 0 : index
    %74 = vector.load %arg6[%c1, %c0_44, %c0_45] : memref<2x8x8xf32, #tpu.memory_space<vmem>>, vector<1x8x8xf32>
    %75 = vector.shape_cast %74 : vector<1x8x8xf32> to vector<8x8xf32>
    %76 = arith.addf %73, %75 : vector<8x8xf32>
    %77 = vector.broadcast %46 : vector<1x8xf32> to vector<8x8xf32>
    %78 = arith.addf %76, %77 : vector<8x8xf32>
    %cst_46 = arith.constant dense<0xFF800000> : vector<8xf32>
    %79 = vector.multi_reduction <maximumf>, %78, %cst_46 [1] : vector<8x8xf32> to vector<8xf32>
    %80 = vector.shape_cast %79 : vector<8xf32> to vector<8x1xf32>
    %81 = vector.broadcast %80 : vector<8x1xf32> to vector<8x8xf32>
    %82 = arith.subf %78, %81 : vector<8x8xf32>
    %83 = math.exp %82 : vector<8x8xf32>
    %cst_47 = arith.constant dense<0.000000e+00> : vector<8xf32>
    %84 = vector.multi_reduction <add>, %83, %cst_47 [1] : vector<8x8xf32> to vector<8xf32>
    %85 = vector.shape_cast %84 : vector<8xf32> to vector<8x1xf32>
    %86 = tpu.reciprocal %85 {approx = true} : vector<8x1xf32> -> vector<8x1xf32>
    %87 = vector.broadcast %86 : vector<8x1xf32> to vector<8x8xf32>
    %88 = arith.mulf %83, %87 : vector<8x8xf32>
    %89 = arith.truncf %88 : vector<8x8xf32> to vector<8x8xbf16>
    %90 = vector.extract_strided_slice %23 {offsets = [0, 16], sizes = [8, 16], strides = [1, 1]} : vector<8x32xbf16> to vector<8x16xbf16>
    %cst_48 = arith.constant dense<0.000000e+00> : vector<8x16xf32>
    %91 = tpu.matmul %89, %90, %cst_48 {dimension_numbers = #tpu.dot_dimension_numbers<[1], [0], [0], [1], [0, 0, 1, 1], [], []>} : vector<8x8xbf16>, vector<8x16xbf16>, vector<8x16xf32> -> vector<8x16xf32>
    %c0_49 = arith.constant 0 : index
    %c16 = arith.constant 16 : index
    %92 = vector.load %arg25[%c0_49, %c16] : memref<8x32xf32, #tpu.memory_space<vmem>>, vector<8x16xf32>
    tpu.vector_store %arg25[%c0_49, %c16], %91 {strides = array<i32>} : memref<8x32xf32, #tpu.memory_space<vmem>>, vector<8x16xf32>,
    %c0_50 = arith.constant 0 : index
    %c0_51 = arith.constant 0 : index
    %93 = vector.load %arg25[%c0_50, %c0_51] : memref<8x32xf32, #tpu.memory_space<vmem>>, vector<8x32xf32>
    %94 = arith.truncf %93 : vector<8x32xf32> to vector<8x32xbf16>
    %c0_52 = arith.constant 0 : index
    %c0_53 = arith.constant 0 : index
    %95 = vector.load %arg14[%c0_52, %c0_53] : memref<32x32xbf16, #tpu.memory_space<vmem>>, vector<32x32xbf16>
    %cst_54 = arith.constant dense<0.000000e+00> : vector<8x32xf32>
    %96 = tpu.matmul %94, %95, %cst_54 {dimension_numbers = #tpu.dot_dimension_numbers<[1], [0], [0], [1], [0, 0, 1, 1], [], []>} : vector<8x32xbf16>, vector<32x32xbf16>, vector<8x32xf32> -> vector<8x32xf32>
    %c0_55 = arith.constant 0 : index
    %c0_56 = arith.constant 0 : index
    %97 = vector.load %arg15[%c0_55, %c0_56] : memref<1x32xf32, #tpu.memory_space<vmem>>, vector<1x32xf32>
    %98 = vector.broadcast %97 : vector<1x32xf32> to vector<8x32xf32>
    %99 = arith.addf %96, %98 : vector<8x32xf32>
    %100 = arith.addf %99, %1 : vector<8x32xf32>
    %c0_57 = arith.constant 0 : index
    %c0_58 = arith.constant 0 : index
    %101 = vector.load %arg16[%c0_57, %c0_58] : memref<1x32xf32, #tpu.memory_space<vmem>>, vector<1x32xf32>
    %c0_59 = arith.constant 0 : index
    %c0_60 = arith.constant 0 : index
    %102 = vector.load %arg17[%c0_59, %c0_60] : memref<1x32xf32, #tpu.memory_space<vmem>>, vector<1x32xf32>
    %cst_61 = arith.constant dense<0.000000e+00> : vector<8xf32>
    %103 = vector.multi_reduction <add>, %100, %cst_61 [1] : vector<8x32xf32> to vector<8xf32>
    %104 = vector.shape_cast %103 : vector<8xf32> to vector<8x1xf32>
    %cst_62 = arith.constant 3.200000e+01 : f32
    %105 = vector.broadcast %cst_62 : f32 to vector<8x1xf32>
    %106 = arith.divf %104, %105 : vector<8x1xf32>
    %107 = vector.broadcast %106 : vector<8x1xf32> to vector<8x32xf32>
    %108 = arith.subf %100, %107 : vector<8x32xf32>
    %109 = arith.mulf %108, %108 : vector<8x32xf32>
    %cst_63 = arith.constant dense<0.000000e+00> : vector<8xf32>
    %110 = vector.multi_reduction <add>, %109, %cst_63 [1] : vector<8x32xf32> to vector<8xf32>
    %111 = vector.shape_cast %110 : vector<8xf32> to vector<8x1xf32>
    %cst_64 = arith.constant 3.200000e+01 : f32
    %112 = vector.broadcast %cst_64 : f32 to vector<8x1xf32>
    %113 = arith.divf %111, %112 : vector<8x1xf32>
    %cst_65 = arith.constant 9.99999996E-13 : f32
    %114 = vector.broadcast %cst_65 : f32 to vector<8x1xf32>
    %115 = arith.addf %113, %114 : vector<8x1xf32>
    %116 = math.rsqrt %115 : vector<8x1xf32>
    %117 = vector.broadcast %116 : vector<8x1xf32> to vector<8x32xf32>
    %118 = arith.mulf %108, %117 : vector<8x32xf32>
    %119 = vector.broadcast %101 : vector<1x32xf32> to vector<8x32xf32>
    %120 = arith.mulf %118, %119 : vector<8x32xf32>
    %121 = vector.broadcast %102 : vector<1x32xf32> to vector<8x32xf32>
    %122 = arith.addf %120, %121 : vector<8x32xf32>
    %123 = arith.truncf %122 : vector<8x32xf32> to vector<8x32xbf16>
    %c0_66 = arith.constant 0 : index
    %c0_67 = arith.constant 0 : index
    %124 = vector.load %arg18[%c0_66, %c0_67] : memref<32x64xbf16, #tpu.memory_space<vmem>>, vector<32x64xbf16>
    %cst_68 = arith.constant dense<0.000000e+00> : vector<8x64xf32>
    %125 = tpu.matmul %123, %124, %cst_68 {dimension_numbers = #tpu.dot_dimension_numbers<[1], [0], [0], [1], [0, 0, 1, 1], [], []>} : vector<8x32xbf16>, vector<32x64xbf16>, vector<8x64xf32> -> vector<8x64xf32>
    %c0_69 = arith.constant 0 : index
    %c0_70 = arith.constant 0 : index
    %126 = vector.load %arg19[%c0_69, %c0_70] : memref<1x64xf32, #tpu.memory_space<vmem>>, vector<1x64xf32>
    %127 = vector.broadcast %126 : vector<1x64xf32> to vector<8x64xf32>
    %128 = arith.addf %125, %127 : vector<8x64xf32>
    %129 = arith.mulf %128, %128 : vector<8x64xf32>
    %130 = arith.mulf %128, %129 : vector<8x64xf32>
    %cst_71 = arith.constant 4.471500e-02 : f32
    %131 = vector.broadcast %cst_71 : f32 to vector<8x64xf32>
    %132 = arith.mulf %131, %130 : vector<8x64xf32>
    %133 = arith.addf %128, %132 : vector<8x64xf32>
    %cst_72 = arith.constant 0.797884583 : f32
    %134 = vector.broadcast %cst_72 : f32 to vector<8x64xf32>
    %135 = arith.mulf %134, %133 : vector<8x64xf32>
    %136 = math.tanh %135 : vector<8x64xf32>
    %cst_73 = arith.constant 1.000000e+00 : f32
    %137 = vector.broadcast %cst_73 : f32 to vector<8x64xf32>
    %138 = arith.addf %137, %136 : vector<8x64xf32>
    %cst_74 = arith.constant 5.000000e-01 : f32
    %139 = vector.broadcast %cst_74 : f32 to vector<8x64xf32>
    %140 = arith.mulf %139, %138 : vector<8x64xf32>
    %141 = arith.mulf %128, %140 : vector<8x64xf32>
    %142 = arith.truncf %141 : vector<8x64xf32> to vector<8x64xbf16>
    %c0_75 = arith.constant 0 : index
    %c0_76 = arith.constant 0 : index
    %143 = vector.load %arg20[%c0_75, %c0_76] : memref<64x32xbf16, #tpu.memory_space<vmem>>, vector<64x32xbf16>
    %cst_77 = arith.constant dense<0.000000e+00> : vector<8x32xf32>
    %144 = tpu.matmul %142, %143, %cst_77 {dimension_numbers = #tpu.dot_dimension_numbers<[1], [0], [0], [1], [0, 0, 1, 1], [], []>} : vector<8x64xbf16>, vector<64x32xbf16>, vector<8x32xf32> -> vector<8x32xf32>
    %c0_78 = arith.constant 0 : index
    %c0_79 = arith.constant 0 : index
    %145 = vector.load %arg21[%c0_78, %c0_79] : memref<1x32xf32, #tpu.memory_space<vmem>>, vector<1x32xf32>
    %146 = vector.broadcast %145 : vector<1x32xf32> to vector<8x32xf32>
    %147 = arith.addf %144, %146 : vector<8x32xf32>
    %148 = arith.addf %147, %122 : vector<8x32xf32>
    %c0_80 = arith.constant 0 : index
    %c0_81 = arith.constant 0 : index
    %149 = vector.load %arg22[%c0_80, %c0_81] : memref<1x32xf32, #tpu.memory_space<vmem>>, vector<1x32xf32>
    %c0_82 = arith.constant 0 : index
    %c0_83 = arith.constant 0 : index
    %150 = vector.load %arg23[%c0_82, %c0_83] : memref<1x32xf32, #tpu.memory_space<vmem>>, vector<1x32xf32>
    %cst_84 = arith.constant dense<0.000000e+00> : vector<8xf32>
    %151 = vector.multi_reduction <add>, %148, %cst_84 [1] : vector<8x32xf32> to vector<8xf32>
    %152 = vector.shape_cast %151 : vector<8xf32> to vector<8x1xf32>
    %cst_85 = arith.constant 3.200000e+01 : f32
    %153 = vector.broadcast %cst_85 : f32 to vector<8x1xf32>
    %154 = arith.divf %152, %153 : vector<8x1xf32>
    %155 = vector.broadcast %154 : vector<8x1xf32> to vector<8x32xf32>
    %156 = arith.subf %148, %155 : vector<8x32xf32>
    %157 = arith.mulf %156, %156 : vector<8x32xf32>
    %cst_86 = arith.constant dense<0.000000e+00> : vector<8xf32>
    %158 = vector.multi_reduction <add>, %157, %cst_86 [1] : vector<8x32xf32> to vector<8xf32>
    %159 = vector.shape_cast %158 : vector<8xf32> to vector<8x1xf32>
    %cst_87 = arith.constant 3.200000e+01 : f32
    %160 = vector.broadcast %cst_87 : f32 to vector<8x1xf32>
    %161 = arith.divf %159, %160 : vector<8x1xf32>
    %cst_88 = arith.constant 9.99999996E-13 : f32
    %162 = vector.broadcast %cst_88 : f32 to vector<8x1xf32>
    %163 = arith.addf %161, %162 : vector<8x1xf32>
    %164 = math.rsqrt %163 : vector<8x1xf32>
    %165 = vector.broadcast %164 : vector<8x1xf32> to vector<8x32xf32>
    %166 = arith.mulf %156, %165 : vector<8x32xf32>
    %167 = vector.broadcast %149 : vector<1x32xf32> to vector<8x32xf32>
    %168 = arith.mulf %166, %167 : vector<8x32xf32>
    %169 = vector.broadcast %150 : vector<1x32xf32> to vector<8x32xf32>
    %170 = arith.addf %168, %169 : vector<8x32xf32>
    %c0_89 = arith.constant 0 : index
    %c0_90 = arith.constant 0 : index
    %c0_91 = arith.constant 0 : index
    %171 = vector.load %arg24[%c0_89, %c0_90, %c0_91] : memref<1x8x32xf32, #tpu.memory_space<vmem>>, vector<1x8x32xf32>
    %172 = vector.shape_cast %171 : vector<1x8x32xf32> to vector<8x32xf32>
    %173 = vector.shape_cast %170 : vector<8x32xf32> to vector<1x8x32xf32>
    tpu.vector_store %arg24[%c0_89, %c0_90, %c0_91], %173 {strides = array<i32>} : memref<1x8x32xf32, #tpu.memory_space<vmem>>, vector<1x8x32xf32>,
    return
  }
  func.func @transform_0(%arg0: i32, %arg1: i32) -> (i32, i32, i32) {
    %c0_i32 = arith.constant 0 : i32
    %c0_i32_0 = arith.constant 0 : i32
    return %arg0, %arg1, %c0_i32 : i32, i32, i32
  }
  func.func @transform_1(%arg0: i32, %arg1: i32) -> (i32, i32, i32) {
    %c0_i32 = arith.constant 0 : i32
    %c0_i32_0 = arith.constant 0 : i32
    %c0_i32_1 = arith.constant 0 : i32
    return %arg0, %c0_i32, %c0_i32_0 : i32, i32, i32
  }
  func.func @transform_2(%arg0: i32, %arg1: i32) -> (i32, i32, i32) {
    %c0_i32 = arith.constant 0 : i32
    %c0_i32_0 = arith.constant 0 : i32
    return %arg0, %arg1, %c0_i32 : i32, i32, i32
  }
  func.func @transform_3(%arg0: i32, %arg1: i32) -> (i32, i32, i32) {
    %c0_i32 = arith.constant 0 : i32
    %c0_i32_0 = arith.constant 0 : i32
    %c0_i32_1 = arith.constant 0 : i32
    return %arg0, %c0_i32, %c0_i32_0 : i32, i32, i32
  }
  func.func @transform_4(%arg0: i32, %arg1: i32) -> (i32, i32, i32) {
    %c0_i32 = arith.constant 0 : i32
    %c0_i32_0 = arith.constant 0 : i32
    %c0_i32_1 = arith.constant 0 : i32
    return %c0_i32, %arg1, %c0_i32_0 : i32, i32, i32
  }
  func.func @transform_5(%arg0: i32, %arg1: i32) -> (i32, i32, i32) {
    %c0_i32 = arith.constant 0 : i32
    %c0_i32_0 = arith.constant 0 : i32
    %c0_i32_1 = arith.constant 0 : i32
    return %arg0, %c0_i32, %c0_i32_0 : i32, i32, i32
  }
  func.func @transform_6(%arg0: i32, %arg1: i32) -> (i32, i32) {
    %c0_i32 = arith.constant 0 : i32
    %c0_i32_0 = arith.constant 0 : i32
    %c0_i32_1 = arith.constant 0 : i32
    return %c0_i32, %c0_i32_0 : i32, i32
  }
  func.func @transform_7(%arg0: i32, %arg1: i32) -> (i32, i32) {
    %c0_i32 = arith.constant 0 : i32
    %c0_i32_0 = arith.constant 0 : i32
    %c0_i32_1 = arith.constant 0 : i32
    return %c0_i32, %c0_i32_0 : i32, i32
  }
  func.func @transform_8(%arg0: i32, %arg1: i32) -> (i32, i32) {
    %c0_i32 = arith.constant 0 : i32
    %c0_i32_0 = arith.constant 0 : i32
    %c0_i32_1 = arith.constant 0 : i32
    return %c0_i32, %c0_i32_0 : i32, i32
  }
  func.func @transform_9(%arg0: i32, %arg1: i32) -> (i32, i32) {
    %c0_i32 = arith.constant 0 : i32
    %c0_i32_0 = arith.constant 0 : i32
    %c0_i32_1 = arith.constant 0 : i32
    return %c0_i32, %c0_i32_0 : i32, i32
  }
  func.func @transform_10(%arg0: i32, %arg1: i32) -> (i32, i32) {
    %c0_i32 = arith.constant 0 : i32
    %c0_i32_0 = arith.constant 0 : i32
    %c0_i32_1 = arith.constant 0 : i32
    return %c0_i32, %c0_i32_0 : i32, i32
  }
  func.func @transform_11(%arg0: i32, %arg1: i32) -> (i32, i32) {
    %c0_i32 = arith.constant 0 : i32
    %c0_i32_0 = arith.constant 0 : i32
    %c0_i32_1 = arith.constant 0 : i32
    return %c0_i32, %c0_i32_0 : i32, i32
  }
  func.func @transform_12(%arg0: i32, %arg1: i32) -> (i32, i32) {
    %c0_i32 = arith.constant 0 : i32
    %c0_i32_0 = arith.constant 0 : i32
    %c0_i32_1 = arith.constant 0 : i32
    return %c0_i32, %c0_i32_0 : i32, i32
  }
  func.func @transform_13(%arg0: i32, %arg1: i32) -> (i32, i32) {
    %c0_i32 = arith.constant 0 : i32
    %c0_i32_0 = arith.constant 0 : i32
    %c0_i32_1 = arith.constant 0 : i32
    return %c0_i32, %c0_i32_0 : i32, i32
  }
  func.func @transform_14(%arg0: i32, %arg1: i32) -> (i32, i32) {
    %c0_i32 = arith.constant 0 : i32
    %c0_i32_0 = arith.constant 0 : i32
    %c0_i32_1 = arith.constant 0 : i32
    return %c0_i32, %c0_i32_0 : i32, i32
  }
  func.func @transform_15(%arg0: i32, %arg1: i32) -> (i32, i32) {
    %c0_i32 = arith.constant 0 : i32
    %c0_i32_0 = arith.constant 0 : i32
    %c0_i32_1 = arith.constant 0 : i32
    return %c0_i32, %c0_i32_0 : i32, i32
  }
  func.func @transform_16(%arg0: i32, %arg1: i32) -> (i32, i32) {
    %c0_i32 = arith.constant 0 : i32
    %c0_i32_0 = arith.constant 0 : i32
    %c0_i32_1 = arith.constant 0 : i32
    return %c0_i32, %c0_i32_0 : i32, i32
  }
  func.func @transform_17(%arg0: i32, %arg1: i32) -> (i32, i32) {
    %c0_i32 = arith.constant 0 : i32
    %c0_i32_0 = arith.constant 0 : i32
    %c0_i32_1 = arith.constant 0 : i32
    return %c0_i32, %c0_i32_0 : i32, i32
  }
  func.func @transform_18(%arg0: i32, %arg1: i32) -> (i32, i32) {
    %c0_i32 = arith.constant 0 : i32
    %c0_i32_0 = arith.constant 0 : i32
    %c0_i32_1 = arith.constant 0 : i32
    return %c0_i32, %c0_i32_0 : i32, i32
  }
  func.func @transform_19(%arg0: i32, %arg1: i32) -> (i32, i32) {
    %c0_i32 = arith.constant 0 : i32
    %c0_i32_0 = arith.constant 0 : i32
    %c0_i32_1 = arith.constant 0 : i32
    return %c0_i32, %c0_i32_0 : i32, i32
  }
  func.func @transform_20(%arg0: i32, %arg1: i32) -> (i32, i32) {
    %c0_i32 = arith.constant 0 : i32
    %c0_i32_0 = arith.constant 0 : i32
    %c0_i32_1 = arith.constant 0 : i32
    return %c0_i32, %c0_i32_0 : i32, i32
  }
  func.func @transform_21(%arg0: i32, %arg1: i32) -> (i32, i32) {
    %c0_i32 = arith.constant 0 : i32
    %c0_i32_0 = arith.constant 0 : i32
    %c0_i32_1 = arith.constant 0 : i32
    return %c0_i32, %c0_i32_0 : i32, i32
  }
  func.func @transform_22(%arg0: i32, %arg1: i32) -> (i32, i32, i32) {
    %c0_i32 = arith.constant 0 : i32
    %c0_i32_0 = arith.constant 0 : i32
    return %arg0, %arg1, %c0_i32 : i32, i32, i32
  }
}

module attributes {stable_mosaic.version = 11 : i64} {
  func.func @_akt_layer_kernel(%arg0: i32, %arg1: i32, %arg2: memref<1x8x32xf32, #tpu.memory_space<vmem>>, %arg3: memref<1x8x32xf32, #tpu.memory_space<vmem>>, %arg4: memref<1x8x1xi32, #tpu.memory_space<vmem>>, %arg5: memref<1x1x8xi32, #tpu.memory_space<vmem>>, %arg6: memref<2x8x8xf32, #tpu.memory_space<vmem>>, %arg7: memref<1x1x8xf32, #tpu.memory_space<vmem>>, %arg8: memref<32x32xbf16, #tpu.memory_space<vmem>>, %arg9: memref<1x32xf32, #tpu.memory_space<vmem>>, %arg10: memref<32x32xbf16, #tpu.memory_space<vmem>>, %arg11: memref<1x32xf32, #tpu.memory_space<vmem>>, %arg12: memref<32x32xbf16, #tpu.memory_space<vmem>>, %arg13: memref<1x32xf32, #tpu.memory_space<vmem>>, %arg14: memref<32x32xbf16, #tpu.memory_space<vmem>>, %arg15: memref<1x32xf32, #tpu.memory_space<vmem>>, %arg16: memref<1x32xf32, #tpu.memory_space<vmem>>, %arg17: memref<1x32xf32, #tpu.memory_space<vmem>>, %arg18: memref<32x64xbf16, #tpu.memory_space<vmem>>, %arg19: memref<1x64xf32, #tpu.memory_space<vmem>>, %arg20: memref<64x32xbf16, #tpu.memory_space<vmem>>, %arg21: memref<1x32xf32, #tpu.memory_space<vmem>>, %arg22: memref<1x32xf32, #tpu.memory_space<vmem>>, %arg23: memref<1x32xf32, #tpu.memory_space<vmem>>, %arg24: memref<1x8x32xf32, #tpu.memory_space<vmem>>, %arg25: memref<8x32xf32, #tpu.memory_space<vmem>>) attributes {dimension_semantics = [#tpu.dimension_semantics<parallel>, #tpu.dimension_semantics<parallel>], iteration_bounds = array<i64: 2, 1>, scalar_prefetch = 0 : i64, scratch_operands = 1 : i64, tpu.core_type = #tpu.core_type<tc>, window_params = [{transform_indices = @transform_0, window_bounds = array<i64: 1, 8, 32>}, {transform_indices = @transform_1, window_bounds = array<i64: 1, 8, 32>}, {transform_indices = @transform_2, window_bounds = array<i64: 1, 8, 1>}, {transform_indices = @transform_3, window_bounds = array<i64: 1, 1, 8>}, {transform_indices = @transform_4, window_bounds = array<i64: 2, 8, 8>}, {transform_indices = @transform_5, window_bounds = array<i64: 1, 1, 8>}, {pipeline_mode = #tpu.pipeline_mode<synchronous>, transform_indices = @transform_6, window_bounds = array<i64: 32, 32>}, {pipeline_mode = #tpu.pipeline_mode<synchronous>, transform_indices = @transform_7, window_bounds = array<i64: 1, 32>}, {pipeline_mode = #tpu.pipeline_mode<synchronous>, transform_indices = @transform_8, window_bounds = array<i64: 32, 32>}, {pipeline_mode = #tpu.pipeline_mode<synchronous>, transform_indices = @transform_9, window_bounds = array<i64: 1, 32>}, {pipeline_mode = #tpu.pipeline_mode<synchronous>, transform_indices = @transform_10, window_bounds = array<i64: 32, 32>}, {pipeline_mode = #tpu.pipeline_mode<synchronous>, transform_indices = @transform_11, window_bounds = array<i64: 1, 32>}, {pipeline_mode = #tpu.pipeline_mode<synchronous>, transform_indices = @transform_12, window_bounds = array<i64: 32, 32>}, {pipeline_mode = #tpu.pipeline_mode<synchronous>, transform_indices = @transform_13, window_bounds = array<i64: 1, 32>}, {pipeline_mode = #tpu.pipeline_mode<synchronous>, transform_indices = @transform_14, window_bounds = array<i64: 1, 32>}, {pipeline_mode = #tpu.pipeline_mode<synchronous>, transform_indices = @transform_15, window_bounds = array<i64: 1, 32>}, {pipeline_mode = #tpu.pipeline_mode<synchronous>, transform_indices = @transform_16, window_bounds = array<i64: 32, 64>}, {pipeline_mode = #tpu.pipeline_mode<synchronous>, transform_indices = @transform_17, window_bounds = array<i64: 1, 64>}, {pipeline_mode = #tpu.pipeline_mode<synchronous>, transform_indices = @transform_18, window_bounds = array<i64: 64, 32>}, {pipeline_mode = #tpu.pipeline_mode<synchronous>, transform_indices = @transform_19, window_bounds = array<i64: 1, 32>}, {pipeline_mode = #tpu.pipeline_mode<synchronous>, transform_indices = @transform_20, window_bounds = array<i64: 1, 32>}, {pipeline_mode = #tpu.pipeline_mode<synchronous>, transform_indices = @transform_21, window_bounds = array<i64: 1, 32>}, {transform_indices = @transform_22, window_bounds = array<i64: 1, 8, 32>}]} {
    %c0 = arith.constant 0 : index
    %c0_0 = arith.constant 0 : index
    %c0_1 = arith.constant 0 : index
    %0 = vector.load %arg2[%c0, %c0_0, %c0_1] : memref<1x8x32xf32, #tpu.memory_space<vmem>>, vector<1x8x32xf32>
    %1 = vector.shape_cast %0 : vector<1x8x32xf32> to vector<8x32xf32>
    %c0_2 = arith.constant 0 : index
    %c0_3 = arith.constant 0 : index
    %c0_4 = arith.constant 0 : index
    %2 = vector.load %arg3[%c0_2, %c0_3, %c0_4] : memref<1x8x32xf32, #tpu.memory_space<vmem>>, vector<1x8x32xf32>
    %3 = vector.shape_cast %2 : vector<1x8x32xf32> to vector<8x32xf32>
    %4 = arith.truncf %1 : vector<8x32xf32> to vector<8x32xbf16>
    %5 = arith.truncf %3 : vector<8x32xf32> to vector<8x32xbf16>
    %c0_5 = arith.constant 0 : index
    %c0_6 = arith.constant 0 : index
    %6 = vector.load %arg8[%c0_5, %c0_6] : memref<32x32xbf16, #tpu.memory_space<vmem>>, vector<32x32xbf16>
    %cst = arith.constant dense<0.000000e+00> : vector<8x32xf32>
    %7 = tpu.matmul %4, %6, %cst {dimension_numbers = #tpu.dot_dimension_numbers<[1], [0], [0], [1], [0, 0, 1, 1], [], []>} : vector<8x32xbf16>, vector<32x32xbf16>, vector<8x32xf32> -> vector<8x32xf32>
    %c0_7 = arith.constant 0 : index
    %c0_8 = arith.constant 0 : index
    %8 = vector.load %arg9[%c0_7, %c0_8] : memref<1x32xf32, #tpu.memory_space<vmem>>, vector<1x32xf32>
    %9 = vector.broadcast %8 : vector<1x32xf32> to vector<8x32xf32>
    %10 = arith.addf %7, %9 : vector<8x32xf32>
    %c0_9 = arith.constant 0 : index
    %c0_10 = arith.constant 0 : index
    %11 = vector.load %arg10[%c0_9, %c0_10] : memref<32x32xbf16, #tpu.memory_space<vmem>>, vector<32x32xbf16>
    %cst_11 = arith.constant dense<0.000000e+00> : vector<8x32xf32>
    %12 = tpu.matmul %5, %11, %cst_11 {dimension_numbers = #tpu.dot_dimension_numbers<[1], [0], [0], [1], [0, 0, 1, 1], [], []>} : vector<8x32xbf16>, vector<32x32xbf16>, vector<8x32xf32> -> vector<8x32xf32>
    %c0_12 = arith.constant 0 : index
    %c0_13 = arith.constant 0 : index
    %13 = vector.load %arg11[%c0_12, %c0_13] : memref<1x32xf32, #tpu.memory_space<vmem>>, vector<1x32xf32>
    %14 = vector.broadcast %13 : vector<1x32xf32> to vector<8x32xf32>
    %15 = arith.addf %12, %14 : vector<8x32xf32>
    %c0_14 = arith.constant 0 : index
    %c0_15 = arith.constant 0 : index
    %16 = vector.load %arg12[%c0_14, %c0_15] : memref<32x32xbf16, #tpu.memory_space<vmem>>, vector<32x32xbf16>
    %cst_16 = arith.constant dense<0.000000e+00> : vector<8x32xf32>
    %17 = tpu.matmul %5, %16, %cst_16 {dimension_numbers = #tpu.dot_dimension_numbers<[1], [0], [0], [1], [0, 0, 1, 1], [], []>} : vector<8x32xbf16>, vector<32x32xbf16>, vector<8x32xf32> -> vector<8x32xf32>
    %c0_17 = arith.constant 0 : index
    %c0_18 = arith.constant 0 : index
    %18 = vector.load %arg13[%c0_17, %c0_18] : memref<1x32xf32, #tpu.memory_space<vmem>>, vector<1x32xf32>
    %19 = vector.broadcast %18 : vector<1x32xf32> to vector<8x32xf32>
    %20 = arith.addf %17, %19 : vector<8x32xf32>
    %21 = arith.truncf %10 : vector<8x32xf32> to vector<8x32xbf16>
    %22 = arith.truncf %15 : vector<8x32xf32> to vector<8x32xbf16>
    %23 = arith.truncf %20 : vector<8x32xf32> to vector<8x32xbf16>
    %c0_19 = arith.constant 0 : index
    %c0_20 = arith.constant 0 : index
    %c0_21 = arith.constant 0 : index
    %24 = vector.load %arg4[%c0_19, %c0_20, %c0_21] : memref<1x8x1xi32, #tpu.memory_space<vmem>>, vector<1x8x1xi32>
    %25 = vector.shape_cast %24 : vector<1x8x1xi32> to vector<8x1xi32>
    %c0_22 = arith.constant 0 : index
    %c0_23 = arith.constant 0 : index
    %c0_24 = arith.constant 0 : index
    %26 = vector.load %arg5[%c0_22, %c0_23, %c0_24] : memref<1x1x8xi32, #tpu.memory_space<vmem>>, vector<1x1x8xi32>
    %27 = vector.shape_cast %26 : vector<1x1x8xi32> to vector<1x8xi32>
    %28 = vector.broadcast %25 : vector<8x1xi32> to vector<8x8xi32>
    %29 = vector.broadcast %27 : vector<1x8xi32> to vector<8x8xi32>
    %30 = arith.subi %28, %29 : vector<8x8xi32>
    %31 = arith.sitofp %30 : vector<8x8xi32> to vector<8x8xf32>
    %cst_25 = arith.constant 1.66666669E-5 : f32
    %32 = vector.broadcast %cst_25 : f32 to vector<8x8xf32>
    %33 = arith.mulf %31, %32 : vector<8x8xf32>
    %cst_26 = arith.constant 0.000000e+00 : f32
    %34 = vector.broadcast %cst_26 : f32 to vector<8x8xf32>
    %35 = arith.maximumf %33, %34 : vector<8x8xf32>
    %cst_27 = arith.constant 1.000000e+00 : f32
    %36 = vector.broadcast %cst_27 : f32 to vector<8x8xf32>
    %37 = arith.addf %35, %36 : vector<8x8xf32>
    %cst_28 = arith.constant 1.000000e+00 : f32
    %38 = vector.broadcast %cst_28 : f32 to vector<8x8xf32>
    %39 = arith.divf %38, %37 : vector<8x8xf32>
    %cst_29 = arith.constant 4.000000e+00 : f32
    %40 = vector.broadcast %cst_29 : f32 to vector<8x8xf32>
    %41 = arith.subf %40, %39 : vector<8x8xf32>
    %cst_30 = arith.constant 1.000000e+00 : f32
    %42 = vector.broadcast %cst_30 : f32 to vector<8x8xf32>
    %43 = arith.addf %41, %42 : vector<8x8xf32>
    %44 = tpu.reciprocal %43 {approx = true} : vector<8x8xf32> -> vector<8x8xf32>
    %c0_31 = arith.constant 0 : index
    %c0_32 = arith.constant 0 : index
    %c0_33 = arith.constant 0 : index
    %45 = vector.load %arg7[%c0_31, %c0_32, %c0_33] : memref<1x1x8xf32, #tpu.memory_space<vmem>>, vector<1x1x8xf32>
    %46 = vector.shape_cast %45 : vector<1x1x8xf32> to vector<1x8xf32>
    %47 = vector.extract_strided_slice %21 {offsets = [0, 0], sizes = [8, 16], strides = [1, 1]} : vector<8x32xbf16> to vector<8x16xbf16>
    %48 = vector.extract_strided_slice %22 {offsets = [0, 0], sizes = [8, 16], strides = [1, 1]} : vector<8x32xbf16> to vector<8x16xbf16>
    %cst_34 = arith.constant dense<0.000000e+00> : vector<8x8xf32>
    %49 = tpu.matmul %47, %48, %cst_34 {dimension_numbers = #tpu.dot_dimension_numbers<[1], [1], [0], [0], [0, 0, 1, 0], [], []>} : vector<8x16xbf16>, vector<8x16xbf16>, vector<8x8xf32> -> vector<8x8xf32>
    %50 = arith.mulf %49, %44 : vector<8x8xf32>
    %c0_35 = arith.constant 0 : index
    %c0_36 = arith.constant 0 : index
    %c0_37 = arith.constant 0 : index
    %51 = vector.load %arg6[%c0_35, %c0_36, %c0_37] : memref<2x8x8xf32, #tpu.memory_space<vmem>>, vector<1x8x8xf32>
    %52 = vector.shape_cast %51 : vector<1x8x8xf32> to vector<8x8xf32>
    %53 = arith.addf %50, %52 : vector<8x8xf32>
    %54 = vector.broadcast %46 : vector<1x8xf32> to vector<8x8xf32>
    %55 = arith.addf %53, %54 : vector<8x8xf32>
    %cst_38 = arith.constant dense<0xFF800000> : vector<8xf32>
    %56 = vector.multi_reduction <maximumf>, %55, %cst_38 [1] : vector<8x8xf32> to vector<8xf32>
    %57 = vector.shape_cast %56 : vector<8xf32> to vector<8x1xf32>
    %58 = vector.broadcast %57 : vector<8x1xf32> to vector<8x8xf32>
    %59 = arith.subf %55, %58 : vector<8x8xf32>
    %60 = math.exp %59 : vector<8x8xf32>
    %cst_39 = arith.constant dense<0.000000e+00> : vector<8xf32>
    %61 = vector.multi_reduction <add>, %60, %cst_39 [1] : vector<8x8xf32> to vector<8xf32>
    %62 = vector.shape_cast %61 : vector<8xf32> to vector<8x1xf32>
    %63 = tpu.reciprocal %62 {approx = true} : vector<8x1xf32> -> vector<8x1xf32>
    %64 = vector.broadcast %63 : vector<8x1xf32> to vector<8x8xf32>
    %65 = arith.mulf %60, %64 : vector<8x8xf32>
    %66 = arith.truncf %65 : vector<8x8xf32> to vector<8x8xbf16>
    %67 = vector.extract_strided_slice %23 {offsets = [0, 0], sizes = [8, 16], strides = [1, 1]} : vector<8x32xbf16> to vector<8x16xbf16>
    %cst_40 = arith.constant dense<0.000000e+00> : vector<8x16xf32>
    %68 = tpu.matmul %66, %67, %cst_40 {dimension_numbers = #tpu.dot_dimension_numbers<[1], [0], [0], [1], [0, 0, 1, 1], [], []>} : vector<8x8xbf16>, vector<8x16xbf16>, vector<8x16xf32> -> vector<8x16xf32>
    %c0_41 = arith.constant 0 : index
    %c0_42 = arith.constant 0 : index
    %69 = vector.load %arg25[%c0_41, %c0_42] : memref<8x32xf32, #tpu.memory_space<vmem>>, vector<8x16xf32>
    tpu.vector_store %arg25[%c0_41, %c0_42], %68 {strides = array<i32>} : memref<8x32xf32, #tpu.memory_space<vmem>>, vector<8x16xf32>,
    %70 = vector.extract_strided_slice %21 {offsets = [0, 16], sizes = [8, 16], strides = [1, 1]} : vector<8x32xbf16> to vector<8x16xbf16>
    %71 = vector.extract_strided_slice %22 {offsets = [0, 16], sizes = [8, 16], strides = [1, 1]} : vector<8x32xbf16> to vector<8x16xbf16>
    %cst_43 = arith.constant dense<0.000000e+00> : vector<8x8xf32>
    %72 = tpu.matmul %70, %71, %cst_43 {dimension_numbers = #tpu.dot_dimension_numbers<[1], [1], [0], [0], [0, 0, 1, 0], [], []>} : vector<8x16xbf16>, vector<8x16xbf16>, vector<8x8xf32> -> vector<8x8xf32>
    %73 = arith.mulf %72, %44 : vector<8x8xf32>
    %c1 = arith.constant 1 : index
    %c0_44 = arith.constant 0 : index
    %c0_45 = arith.constant 0 : index
    %74 = vector.load %arg6[%c1, %c0_44, %c0_45] : memref<2x8x8xf32, #tpu.memory_space<vmem>>, vector<1x8x8xf32>
    %75 = vector.shape_cast %74 : vector<1x8x8xf32> to vector<8x8xf32>
    %76 = arith.addf %73, %75 : vector<8x8xf32>
    %77 = vector.broadcast %46 : vector<1x8xf32> to vector<8x8xf32>
    %78 = arith.addf %76, %77 : vector<8x8xf32>
    %cst_46 = arith.constant dense<0xFF800000> : vector<8xf32>
    %79 = vector.multi_reduction <maximumf>, %78, %cst_46 [1] : vector<8x8xf32> to vector<8xf32>
    %80 = vector.shape_cast %79 : vector<8xf32> to vector<8x1xf32>
    %81 = vector.broadcast %80 : vector<8x1xf32> to vector<8x8xf32>
    %82 = arith.subf %78, %81 : vector<8x8xf32>
    %83 = math.exp %82 : vector<8x8xf32>
    %cst_47 = arith.constant dense<0.000000e+00> : vector<8xf32>
    %84 = vector.multi_reduction <add>, %83, %cst_47 [1] : vector<8x8xf32> to vector<8xf32>
    %85 = vector.shape_cast %84 : vector<8xf32> to vector<8x1xf32>
    %86 = tpu.reciprocal %85 {approx = true} : vector<8x1xf32> -> vector<8x1xf32>
    %87 = vector.broadcast %86 : vector<8x1xf32> to vector<8x8xf32>
    %88 = arith.mulf %83, %87 : vector<8x8xf32>
    %89 = arith.truncf %88 : vector<8x8xf32> to vector<8x8xbf16>
    %90 = vector.extract_strided_slice %23 {offsets = [0, 16], sizes = [8, 16], strides = [1, 1]} : vector<8x32xbf16> to vector<8x16xbf16>
    %cst_48 = arith.constant dense<0.000000e+00> : vector<8x16xf32>
    %91 = tpu.matmul %89, %90, %cst_48 {dimension_numbers = #tpu.dot_dimension_numbers<[1], [0], [0], [1], [0, 0, 1, 1], [], []>} : vector<8x8xbf16>, vector<8x16xbf16>, vector<8x16xf32> -> vector<8x16xf32>
    %c0_49 = arith.constant 0 : index
    %c16 = arith.constant 16 : index
    %92 = vector.load %arg25[%c0_49, %c16] : memref<8x32xf32, #tpu.memory_space<vmem>>, vector<8x16xf32>
    tpu.vector_store %arg25[%c0_49, %c16], %91 {strides = array<i32>} : memref<8x32xf32, #tpu.memory_space<vmem>>, vector<8x16xf32>,
    %c0_50 = arith.constant 0 : index
    %c0_51 = arith.constant 0 : index
    %93 = vector.load %arg25[%c0_50, %c0_51] : memref<8x32xf32, #tpu.memory_space<vmem>>, vector<8x32xf32>
    %94 = arith.truncf %93 : vector<8x32xf32> to vector<8x32xbf16>
    %c0_52 = arith.constant 0 : index
    %c0_53 = arith.constant 0 : index
    %95 = vector.load %arg14[%c0_52, %c0_53] : memref<32x32xbf16, #tpu.memory_space<vmem>>, vector<32x32xbf16>
    %cst_54 = arith.constant dense<0.000000e+00> : vector<8x32xf32>
    %96 = tpu.matmul %94, %95, %cst_54 {dimension_numbers = #tpu.dot_dimension_numbers<[1], [0], [0], [1], [0, 0, 1, 1], [], []>} : vector<8x32xbf16>, vector<32x32xbf16>, vector<8x32xf32> -> vector<8x32xf32>
    %c0_55 = arith.constant 0 : index
    %c0_56 = arith.constant 0 : index
    %97 = vector.load %arg15[%c0_55, %c0_56] : memref<1x32xf32, #tpu.memory_space<vmem>>, vector<1x32xf32>
    %98 = vector.broadcast %97 : vector<1x32xf32> to vector<8x32xf32>
    %99 = arith.addf %96, %98 : vector<8x32xf32>
    %100 = arith.addf %99, %1 : vector<8x32xf32>
    %c0_57 = arith.constant 0 : index
    %c0_58 = arith.constant 0 : index
    %101 = vector.load %arg16[%c0_57, %c0_58] : memref<1x32xf32, #tpu.memory_space<vmem>>, vector<1x32xf32>
    %c0_59 = arith.constant 0 : index
    %c0_60 = arith.constant 0 : index
    %102 = vector.load %arg17[%c0_59, %c0_60] : memref<1x32xf32, #tpu.memory_space<vmem>>, vector<1x32xf32>
    %cst_61 = arith.constant dense<0.000000e+00> : vector<8xf32>
    %103 = vector.multi_reduction <add>, %100, %cst_61 [1] : vector<8x32xf32> to vector<8xf32>
    %104 = vector.shape_cast %103 : vector<8xf32> to vector<8x1xf32>
    %cst_62 = arith.constant 3.200000e+01 : f32
    %105 = vector.broadcast %cst_62 : f32 to vector<8x1xf32>
    %106 = arith.divf %104, %105 : vector<8x1xf32>
    %107 = vector.broadcast %106 : vector<8x1xf32> to vector<8x32xf32>
    %108 = arith.subf %100, %107 : vector<8x32xf32>
    %109 = arith.mulf %108, %108 : vector<8x32xf32>
    %cst_63 = arith.constant dense<0.000000e+00> : vector<8xf32>
    %110 = vector.multi_reduction <add>, %109, %cst_63 [1] : vector<8x32xf32> to vector<8xf32>
    %111 = vector.shape_cast %110 : vector<8xf32> to vector<8x1xf32>
    %cst_64 = arith.constant 3.200000e+01 : f32
    %112 = vector.broadcast %cst_64 : f32 to vector<8x1xf32>
    %113 = arith.divf %111, %112 : vector<8x1xf32>
    %cst_65 = arith.constant 9.99999996E-13 : f32
    %114 = vector.broadcast %cst_65 : f32 to vector<8x1xf32>
    %115 = arith.addf %113, %114 : vector<8x1xf32>
    %116 = math.rsqrt %115 : vector<8x1xf32>
    %117 = vector.broadcast %116 : vector<8x1xf32> to vector<8x32xf32>
    %118 = arith.mulf %108, %117 : vector<8x32xf32>
    %119 = vector.broadcast %101 : vector<1x32xf32> to vector<8x32xf32>
    %120 = arith.mulf %118, %119 : vector<8x32xf32>
    %121 = vector.broadcast %102 : vector<1x32xf32> to vector<8x32xf32>
    %122 = arith.addf %120, %121 : vector<8x32xf32>
    %123 = arith.truncf %122 : vector<8x32xf32> to vector<8x32xbf16>
    %c0_66 = arith.constant 0 : index
    %c0_67 = arith.constant 0 : index
    %124 = vector.load %arg18[%c0_66, %c0_67] : memref<32x64xbf16, #tpu.memory_space<vmem>>, vector<32x64xbf16>
    %cst_68 = arith.constant dense<0.000000e+00> : vector<8x64xf32>
    %125 = tpu.matmul %123, %124, %cst_68 {dimension_numbers = #tpu.dot_dimension_numbers<[1], [0], [0], [1], [0, 0, 1, 1], [], []>} : vector<8x32xbf16>, vector<32x64xbf16>, vector<8x64xf32> -> vector<8x64xf32>
    %c0_69 = arith.constant 0 : index
    %c0_70 = arith.constant 0 : index
    %126 = vector.load %arg19[%c0_69, %c0_70] : memref<1x64xf32, #tpu.memory_space<vmem>>, vector<1x64xf32>
    %127 = vector.broadcast %126 : vector<1x64xf32> to vector<8x64xf32>
    %128 = arith.addf %125, %127 : vector<8x64xf32>
    %129 = arith.mulf %128, %128 : vector<8x64xf32>
    %130 = arith.mulf %128, %129 : vector<8x64xf32>
    %cst_71 = arith.constant 4.471500e-02 : f32
    %131 = vector.broadcast %cst_71 : f32 to vector<8x64xf32>
    %132 = arith.mulf %131, %130 : vector<8x64xf32>
    %133 = arith.addf %128, %132 : vector<8x64xf32>
    %cst_72 = arith.constant 0.797884583 : f32
    %134 = vector.broadcast %cst_72 : f32 to vector<8x64xf32>
    %135 = arith.mulf %134, %133 : vector<8x64xf32>
    %136 = math.tanh %135 : vector<8x64xf32>
    %cst_73 = arith.constant 1.000000e+00 : f32
    %137 = vector.broadcast %cst_73 : f32 to vector<8x64xf32>
    %138 = arith.addf %137, %136 : vector<8x64xf32>
    %cst_74 = arith.constant 5.000000e-01 : f32
    %139 = vector.broadcast %cst_74 : f32 to vector<8x64xf32>
    %140 = arith.mulf %139, %138 : vector<8x64xf32>
    %141 = arith.mulf %128, %140 : vector<8x64xf32>
    %142 = arith.truncf %141 : vector<8x64xf32> to vector<8x64xbf16>
    %c0_75 = arith.constant 0 : index
    %c0_76 = arith.constant 0 : index
    %143 = vector.load %arg20[%c0_75, %c0_76] : memref<64x32xbf16, #tpu.memory_space<vmem>>, vector<64x32xbf16>
    %cst_77 = arith.constant dense<0.000000e+00> : vector<8x32xf32>
    %144 = tpu.matmul %142, %143, %cst_77 {dimension_numbers = #tpu.dot_dimension_numbers<[1], [0], [0], [1], [0, 0, 1, 1], [], []>} : vector<8x64xbf16>, vector<64x32xbf16>, vector<8x32xf32> -> vector<8x32xf32>
    %c0_78 = arith.constant 0 : index
    %c0_79 = arith.constant 0 : index
    %145 = vector.load %arg21[%c0_78, %c0_79] : memref<1x32xf32, #tpu.memory_space<vmem>>, vector<1x32xf32>
    %146 = vector.broadcast %145 : vector<1x32xf32> to vector<8x32xf32>
    %147 = arith.addf %144, %146 : vector<8x32xf32>
    %148 = arith.addf %147, %122 : vector<8x32xf32>
    %c0_80 = arith.constant 0 : index
    %c0_81 = arith.constant 0 : index
    %149 = vector.load %arg22[%c0_80, %c0_81] : memref<1x32xf32, #tpu.memory_space<vmem>>, vector<1x32xf32>
    %c0_82 = arith.constant 0 : index
    %c0_83 = arith.constant 0 : index
    %150 = vector.load %arg23[%c0_82, %c0_83] : memref<1x32xf32, #tpu.memory_space<vmem>>, vector<1x32xf32>
    %cst_84 = arith.constant dense<0.000000e+00> : vector<8xf32>
    %151 = vector.multi_reduction <add>, %148, %cst_84 [1] : vector<8x32xf32> to vector<8xf32>
    %152 = vector.shape_cast %151 : vector<8xf32> to vector<8x1xf32>
    %cst_85 = arith.constant 3.200000e+01 : f32
    %153 = vector.broadcast %cst_85 : f32 to vector<8x1xf32>
    %154 = arith.divf %152, %153 : vector<8x1xf32>
    %155 = vector.broadcast %154 : vector<8x1xf32> to vector<8x32xf32>
    %156 = arith.subf %148, %155 : vector<8x32xf32>
    %157 = arith.mulf %156, %156 : vector<8x32xf32>
    %cst_86 = arith.constant dense<0.000000e+00> : vector<8xf32>
    %158 = vector.multi_reduction <add>, %157, %cst_86 [1] : vector<8x32xf32> to vector<8xf32>
    %159 = vector.shape_cast %158 : vector<8xf32> to vector<8x1xf32>
    %cst_87 = arith.constant 3.200000e+01 : f32
    %160 = vector.broadcast %cst_87 : f32 to vector<8x1xf32>
    %161 = arith.divf %159, %160 : vector<8x1xf32>
    %cst_88 = arith.constant 9.99999996E-13 : f32
    %162 = vector.broadcast %cst_88 : f32 to vector<8x1xf32>
    %163 = arith.addf %161, %162 : vector<8x1xf32>
    %164 = math.rsqrt %163 : vector<8x1xf32>
    %165 = vector.broadcast %164 : vector<8x1xf32> to vector<8x32xf32>
    %166 = arith.mulf %156, %165 : vector<8x32xf32>
    %167 = vector.broadcast %149 : vector<1x32xf32> to vector<8x32xf32>
    %168 = arith.mulf %166, %167 : vector<8x32xf32>
    %169 = vector.broadcast %150 : vector<1x32xf32> to vector<8x32xf32>
    %170 = arith.addf %168, %169 : vector<8x32xf32>
    %c0_89 = arith.constant 0 : index
    %c0_90 = arith.constant 0 : index
    %c0_91 = arith.constant 0 : index
    %171 = vector.load %arg24[%c0_89, %c0_90, %c0_91] : memref<1x8x32xf32, #tpu.memory_space<vmem>>, vector<1x8x32xf32>
    %172 = vector.shape_cast %171 : vector<1x8x32xf32> to vector<8x32xf32>
    %173 = vector.shape_cast %170 : vector<8x32xf32> to vector<1x8x32xf32>
    tpu.vector_store %arg24[%c0_89, %c0_90, %c0_91], %173 {strides = array<i32>} : memref<1x8x32xf32, #tpu.memory_space<vmem>>, vector<1x8x32xf32>,
    return
  }
  func.func @transform_0(%arg0: i32, %arg1: i32) -> (i32, i32, i32) {
    %c0_i32 = arith.constant 0 : i32
    %c0_i32_0 = arith.constant 0 : i32
    return %arg0, %arg1, %c0_i32 : i32, i32, i32
  }
  func.func @transform_1(%arg0: i32, %arg1: i32) -> (i32, i32, i32) {
    %c0_i32 = arith.constant 0 : i32
    %c0_i32_0 = arith.constant 0 : i32
    %c0_i32_1 = arith.constant 0 : i32
    return %arg0, %c0_i32, %c0_i32_0 : i32, i32, i32
  }
  func.func @transform_2(%arg0: i32, %arg1: i32) -> (i32, i32, i32) {
    %c0_i32 = arith.constant 0 : i32
    %c0_i32_0 = arith.constant 0 : i32
    return %arg0, %arg1, %c0_i32 : i32, i32, i32
  }
  func.func @transform_3(%arg0: i32, %arg1: i32) -> (i32, i32, i32) {
    %c0_i32 = arith.constant 0 : i32
    %c0_i32_0 = arith.constant 0 : i32
    %c0_i32_1 = arith.constant 0 : i32
    return %arg0, %c0_i32, %c0_i32_0 : i32, i32, i32
  }
  func.func @transform_4(%arg0: i32, %arg1: i32) -> (i32, i32, i32) {
    %c0_i32 = arith.constant 0 : i32
    %c0_i32_0 = arith.constant 0 : i32
    %c0_i32_1 = arith.constant 0 : i32
    return %c0_i32, %arg1, %c0_i32_0 : i32, i32, i32
  }
  func.func @transform_5(%arg0: i32, %arg1: i32) -> (i32, i32, i32) {
    %c0_i32 = arith.constant 0 : i32
    %c0_i32_0 = arith.constant 0 : i32
    %c0_i32_1 = arith.constant 0 : i32
    return %arg0, %c0_i32, %c0_i32_0 : i32, i32, i32
  }
  func.func @transform_6(%arg0: i32, %arg1: i32) -> (i32, i32) {
    %c0_i32 = arith.constant 0 : i32
    %c0_i32_0 = arith.constant 0 : i32
    %c0_i32_1 = arith.constant 0 : i32
    return %c0_i32, %c0_i32_0 : i32, i32
  }
  func.func @transform_7(%arg0: i32, %arg1: i32) -> (i32, i32) {
    %c0_i32 = arith.constant 0 : i32
    %c0_i32_0 = arith.constant 0 : i32
    %c0_i32_1 = arith.constant 0 : i32
    return %c0_i32, %c0_i32_0 : i32, i32
  }
  func.func @transform_8(%arg0: i32, %arg1: i32) -> (i32, i32) {
    %c0_i32 = arith.constant 0 : i32
    %c0_i32_0 = arith.constant 0 : i32
    %c0_i32_1 = arith.constant 0 : i32
    return %c0_i32, %c0_i32_0 : i32, i32
  }
  func.func @transform_9(%arg0: i32, %arg1: i32) -> (i32, i32) {
    %c0_i32 = arith.constant 0 : i32
    %c0_i32_0 = arith.constant 0 : i32
    %c0_i32_1 = arith.constant 0 : i32
    return %c0_i32, %c0_i32_0 : i32, i32
  }
  func.func @transform_10(%arg0: i32, %arg1: i32) -> (i32, i32) {
    %c0_i32 = arith.constant 0 : i32
    %c0_i32_0 = arith.constant 0 : i32
    %c0_i32_1 = arith.constant 0 : i32
    return %c0_i32, %c0_i32_0 : i32, i32
  }
  func.func @transform_11(%arg0: i32, %arg1: i32) -> (i32, i32) {
    %c0_i32 = arith.constant 0 : i32
    %c0_i32_0 = arith.constant 0 : i32
    %c0_i32_1 = arith.constant 0 : i32
    return %c0_i32, %c0_i32_0 : i32, i32
  }
  func.func @transform_12(%arg0: i32, %arg1: i32) -> (i32, i32) {
    %c0_i32 = arith.constant 0 : i32
    %c0_i32_0 = arith.constant 0 : i32
    %c0_i32_1 = arith.constant 0 : i32
    return %c0_i32, %c0_i32_0 : i32, i32
  }
  func.func @transform_13(%arg0: i32, %arg1: i32) -> (i32, i32) {
    %c0_i32 = arith.constant 0 : i32
    %c0_i32_0 = arith.constant 0 : i32
    %c0_i32_1 = arith.constant 0 : i32
    return %c0_i32, %c0_i32_0 : i32, i32
  }
  func.func @transform_14(%arg0: i32, %arg1: i32) -> (i32, i32) {
    %c0_i32 = arith.constant 0 : i32
    %c0_i32_0 = arith.constant 0 : i32
    %c0_i32_1 = arith.constant 0 : i32
    return %c0_i32, %c0_i32_0 : i32, i32
  }
  func.func @transform_15(%arg0: i32, %arg1: i32) -> (i32, i32) {
    %c0_i32 = arith.constant 0 : i32
    %c0_i32_0 = arith.constant 0 : i32
    %c0_i32_1 = arith.constant 0 : i32
    return %c0_i32, %c0_i32_0 : i32, i32
  }
  func.func @transform_16(%arg0: i32, %arg1: i32) -> (i32, i32) {
    %c0_i32 = arith.constant 0 : i32
    %c0_i32_0 = arith.constant 0 : i32
    %c0_i32_1 = arith.constant 0 : i32
    return %c0_i32, %c0_i32_0 : i32, i32
  }
  func.func @transform_17(%arg0: i32, %arg1: i32) -> (i32, i32) {
    %c0_i32 = arith.constant 0 : i32
    %c0_i32_0 = arith.constant 0 : i32
    %c0_i32_1 = arith.constant 0 : i32
    return %c0_i32, %c0_i32_0 : i32, i32
  }
  func.func @transform_18(%arg0: i32, %arg1: i32) -> (i32, i32) {
    %c0_i32 = arith.constant 0 : i32
    %c0_i32_0 = arith.constant 0 : i32
    %c0_i32_1 = arith.constant 0 : i32
    return %c0_i32, %c0_i32_0 : i32, i32
  }
  func.func @transform_19(%arg0: i32, %arg1: i32) -> (i32, i32) {
    %c0_i32 = arith.constant 0 : i32
    %c0_i32_0 = arith.constant 0 : i32
    %c0_i32_1 = arith.constant 0 : i32
    return %c0_i32, %c0_i32_0 : i32, i32
  }
  func.func @transform_20(%arg0: i32, %arg1: i32) -> (i32, i32) {
    %c0_i32 = arith.constant 0 : i32
    %c0_i32_0 = arith.constant 0 : i32
    %c0_i32_1 = arith.constant 0 : i32
    return %c0_i32, %c0_i32_0 : i32, i32
  }
  func.func @transform_21(%arg0: i32, %arg1: i32) -> (i32, i32) {
    %c0_i32 = arith.constant 0 : i32
    %c0_i32_0 = arith.constant 0 : i32
    %c0_i32_1 = arith.constant 0 : i32
    return %c0_i32, %c0_i32_0 : i32, i32
  }
  func.func @transform_22(%arg0: i32, %arg1: i32) -> (i32, i32, i32) {
    %c0_i32 = arith.constant 0 : i32
    %c0_i32_0 = arith.constant 0 : i32
    return %arg0, %arg1, %c0_i32 : i32, i32, i32
  }
}

</mosaic_0001>

<bundles_post_ra>
// kernel: tpu_custom_call.1
= control target key start
LH: loop header
LB: loop body
LE: loop exit
PB: predicated region body
PF: predicated region fallthrough
CT: control target
= control target key end

     0   :  { %s2994_s0 = inlined_call_operand.vmem [shape: f32[2,8,32], index: 0, kind: input, shape index: {}]   ;;  %s2995_s1 = inlined_call_operand.vmem [shape: f32[2,8,32], index: 1, kind: input, shape index: {}]   ;;  %s2996_s2 = inlined_call_operand.vmem [shape: s32[2,8,1], index: 2, kind: input, shape index: {}]   ;;  %s2997_s3 = inlined_call_operand.hbm [shape: s32[2,1,8], index: 3, kind: input, shape index: {}]   ;;  %s2998_s4 = inlined_call_operand.vmem [shape: f32[2,8,8], index: 4, kind: input, shape index: {}]   ;;  %s2999_s5 = inlined_call_operand.hbm [shape: f32[2,1,8], index: 5, kind: input, shape index: {}]   ;;  %s3000_s6 = inlined_call_operand.vmem [shape: bf16[32,32], index: 6, kind: input, shape index: {}]   ;;  %s3001_s7 = inlined_call_operand.hbm [shape: f32[1,32], index: 7, kind: input, shape index: {}]   ;;  %s3002_s8 = inlined_call_operand.hbm [shape: bf16[32,32], index: 8, kind: input, shape index: {}]   ;;  %s3003_s9 = inlined_call_operand.vmem [shape: f32[1,32], index: 9, kind: input, shape index: {}]   ;;  %s3004_s10 = inlined_call_operand.hbm [shape: bf16[32,32], index: 10, kind: input, shape index: {}]   ;;  %s3005_s11 = inlined_call_operand.vmem [shape: f32[1,32], index: 11, kind: input, shape index: {}]   ;;  %s3006_s12 = inlined_call_operand.hbm [shape: bf16[32,32], index: 12, kind: input, shape index: {}]   ;;  %s3007_s13 = inlined_call_operand.vmem [shape: f32[1,32], index: 13, kind: input, shape index: {}]   ;;  %s3008_s14 = inlined_call_operand.vmem [shape: f32[1,32], index: 14, kind: input, shape index: {}]   ;;  %s3009_s15 = inlined_call_operand.vmem [shape: f32[1,32], index: 15, kind: input, shape index: {}]   ;;  %s3010_s16 = inlined_call_operand.hbm [shape: bf16[32,64], index: 16, kind: input, shape index: {}]   ;;  %s3011_s17 = inlined_call_operand.vmem [shape: f32[1,64], index: 17, kind: input, shape index: {}]   ;;  %s3012_s18 = inlined_call_operand.vmem [shape: bf16[64,32], index: 18, kind: input, shape index: {}]   ;;  %s3013_s19 = inlined_call_operand.vmem [shape: f32[1,32], index: 19, kind: input, shape index: {}]   ;;  %s3014_s20 = inlined_call_operand.vmem [shape: f32[1,32], index: 20, kind: input, shape index: {}]   ;;  %s3015_s21 = inlined_call_operand.vmem [shape: f32[1,32], index: 21, kind: input, shape index: {}]   ;;  %s3016_s22 = inlined_call_operand.hbm [shape: f32[2,8,32], index: 22, kind: output, shape index: {}]  }
   0x1   :  { %3025 = sst [smem:[#allocation27_spill]] %s2994_s0 }
   0x2   :  { %3026 = sst [smem:[#allocation28_spill]] %s2995_s1 }
   0x3   :  { %3027 = sst [smem:[#allocation29_spill]] %s2996_s2 }
   0x4   :  { %3028 = sst [smem:[#allocation30_spill]] %s2997_s3 }
   0x5   :  { %3029 = sst [smem:[#allocation31_spill]] %s2998_s4 }
   0x6   :  { %3030 = sst [smem:[#allocation32_spill]] %s2999_s5 }
   0x7   :  { %3031 = sst [smem:[#allocation33_spill]] %s3000_s6 }
   0x8   :  { %3032 = sst [smem:[#allocation34_spill]] %s3001_s7 }
   0x9   :  { %3033 = sst [smem:[#allocation35_spill]] %s3002_s8 }
   0xa   :  { %3034 = sst [smem:[#allocation36_spill]] %s3004_s10 }
   0xb   :  { %3035 = sst [smem:[#allocation37_spill]] %s3006_s12 }
   0xc   :  { %3036 = sst [smem:[#allocation38_spill]] %s3010_s16 }
   0xd   :  { %3037 = sst [smem:[#allocation39_spill]] %s3013_s19 }
   0xe   :  { %3038 = sst [smem:[#allocation40_spill]] %s3014_s20 }
   0xf   :  { %3039 = sst [smem:[#allocation41_spill]] %s3015_s21 }
  0x10   :  { %3040 = sst [smem:[#allocation42_spill]] %s3016_s22 }
  0x11   :  { %27 = vsyncpa [#allocation4], 0 }
  0x12   :  { %29 = vsyncpa [#allocation4 + $0x1], 0 }
  0x13   :  { %30 = vsyncpa [#allocation7], 0 }
  0x14   :  { %32 = vsyncpa [#allocation7 + $0x1], 0 }
  0x15   :  { %33 = vsyncpa [#allocation10], 0 }
  0x16   :  { %34 = vsyncpa [#allocation13], 0 }
  0x17   :  { %35 = vsyncpa [#allocation5], 0 }
  0x18   :  { %37 = vsyncpa [#allocation5 + $0x1], 0  ;;  %s2615_s3 = smov 0   ;;  %s2617_s28 = smov 0  }
  0x19   :  { %s2619_s29 = smov 0   ;;  %s2621_s30 = smov 0  }
  0x1a   :  { %s2623_s4 = smov 0   ;;  %s2625_s0 = smov 0  }
  0x1b LB: > { %3041 = sst [smem:[#allocation22_spill]] %s2471_s29  ;;  %s2646_s23 = sadd.s32 4294967295, %s2483_s0   ;;  %s2483_s0 = sphi %s2625_s0, %s43_s0   ;;  %s2479_s4 = sphi %s2623_s4, %s3081_s4   ;;  %s2475_s30 = sphi %s2621_s30, %s3080_s30   ;;  %s2471_s29 = sphi %s2619_s29, %s3079_s29   ;;  %s2467_s28 = sphi %s2617_s28, %s3083_s28   ;;  %s2463_s3 = sphi %s2615_s3, %s3082_s3  }
  0x1c   : > { %3042 = sst [smem:[#allocation23_spill]] %s2479_s4  ;;  %p1877_p0 = scmp.ge.s32.totalorder %s2483_s0, 1 }
  0x1d   : > { %p3024_p1 = scmp.eq.s32.totalorder %s2646_s23, 0  ;;  %p584_p2 = scmp.lt.s32.totalorder %s2483_s0, 3 }
  0x1e   : > { %s2485_s5 = smov [#allocation8]   ;;  %s2486_s6 = smov [#allocation9]  }
  0x1f   : > { %p2651_p3 = pnand %p1877_p0, %p584_p2  ;;  %s607_s24 = sshll.u32 %s2485_s5, 4  ;;  %s608_s24 = int_to_ptr.vmem [resolvable:$true] %s607_s24 }
  0x20   : > { %s617_s25 = sshll.u32 %s2486_s6, 4  ;;  %s2487_s2 = smov [#allocation12]   ;;  %s2664_s25 = int_to_ptr.vmem [resolvable:$true] %s617_s25 }
  0x21   : > { %p2068_p5 = pneg %p2651_p3  ;;  %s649_s27 = sshll.u32 %s2487_s2, 4  ;;  %s650_s27 = int_to_ptr.vmem [resolvable:$true] %s649_s27 }
  0x22   : > { %s2212_s5 = scalar_lea.vmem %s608_s24, 16  ;;  %s2219_s6 = scalar_lea.vmem %s608_s24, 32 }
  0x23   : > { %p2660_p6 = pnand %p2068_p5, %p3024_p1  ;;  %p2213_p8 = scmp.ne.s32.totalorder %s608_s24, %s2212_s5 }
  0x24   : > { %p2220_p11 = scmp.lt.s32.totalorder %s608_s24, %s608_s24  ;;  %p2221_p12 = scmp.lt.s32.totalorder %s2219_s6, %s2212_s5 }
  0x25   : > { %p2668_p7 = pneg %p2660_p6 }
  0x26   : > { %p2222_p13 = por %p2221_p12, %p2220_p11 }
  0x27   : > { %p2215_p9 = pnand %p2213_p8, %p2668_p7 }
  0x29   : > { %p2216_p10 = pneg %p2215_p9 }
  0x2b   : > { %p2223_p0 = pnand %p2222_p13, %p2216_p10 }
  0x2d   : > { %2226 = shalt.err (!%p2223_p0)
}
  0x2e   : > { %s3046_s7 = sld [smem:[#allocation34_spill]]  ;;  %s2238_s20 = scalar_lea.vmem %s2664_s25, 256 }
  0x2f   : > { %p2239_p2 = scmp.ne.s32.totalorder %s2664_s25, %s2238_s20  ;;  %p2246_p9 = scmp.lt.s32.totalorder %s2664_s25, %s2664_s25 }
  0x30   : > { %p2247_p11 = scmp.lt.s32.totalorder %s2238_s20, %s2238_s20 }
  0x31   : > { %p2241_p5 = pnand %p2239_p2, %p2668_p7 }
  0x32   : > { %p2248_p10 = por %p2247_p11, %p2246_p9 }
  0x33   : > { %p2242_p8 = pneg %p2241_p5 }
  0x34   : > { %2071 = dma.hbm_to_vmem [thread:$0]  (!%p2660_p6), %s3046_s7, 16, %s608_s24, [#allocation7]  }
  0x35   : > { %p2249_p12 = pnand %p2248_p10, %p2242_p8 }
  0x37   : > { %2252 = shalt.err (!%p2249_p12)
}
  0x38   : > { %s2488_s5 = smov 64   ;;  %s2489_s21 = smov 4  }
  0x39   : > { %s3047_s8 = sld [smem:[#allocation35_spill]]  ;;  %s2264_s2 = scalar_lea.vmem %s650_s27, 256 }
  0x3a   : > { %p2265_p13 = scmp.ne.s32.totalorder %s650_s27, %s2264_s2  ;;  %p2272_p5 = scmp.lt.s32.totalorder %s650_s27, %s650_s27 }
  0x3b   : > { %p2273_p8 = scmp.lt.s32.totalorder %s2264_s2, %s2264_s2 }
  0x3c   : > { %p2267_p0 = pnand %p2265_p13, %p2668_p7 }
  0x3d   : > { %p2274_p9 = por %p2273_p8, %p2272_p5 }
  0x3e   : > { %p2268_p2 = pneg %p2267_p0 }
  0x3f   : > { %2074 = dma.hbm_to_vmem [thread:$0]  (!%p2660_p6), %s3047_s8, 256, %s2664_s25, [#allocation10], %s2488_s5, %s2488_s5, %s2489_s21  }
  0x40   : > { %p2275_p11 = pnand %p2274_p9, %p2268_p2 }
  0x42   : > { %2278 = shalt.err (!%p2275_p11)
}
  0x43   : > { %s3048_s12 = sld [smem:[#allocation37_spill]]  ;;  %s2490_s25 = smov [#allocation11]  }
  0x44   : > { %s633_s24 = sshll.u32 %s2490_s25, 4  ;;  %s2491_s6 = smov [#allocation14]   ;;  %s634_s24 = int_to_ptr.vmem [resolvable:$true] %s633_s24 }
  0x45   : > { %s671_s8 = sshll.u32 %s2491_s6, 4  ;;  %s2290_s19 = scalar_lea.vmem %s634_s24, 256  ;;  %s672_s8 = int_to_ptr.vmem [resolvable:$true] %s671_s8 }
  0x46   : > { %p2291_p10 = scmp.ne.s32.totalorder %s634_s24, %s2290_s19  ;;  %p2298_p0 = scmp.lt.s32.totalorder %s634_s24, %s634_s24 }
  0x47   : > { %p2299_p2 = scmp.lt.s32.totalorder %s2290_s19, %s2290_s19 }
  0x48   : > { %p2293_p12 = pnand %p2291_p10, %p2668_p7 }
  0x49   : > { %2080 = dma.hbm_to_vmem [thread:$0]  (!%p2660_p6), %s3048_s12, 256, %s650_s27, [#allocation13], %s2488_s5, %s2488_s5, %s2489_s21  }
  0x4a   : > { %p2294_p13 = pneg %p2293_p12  ;;  %p2300_p5 = por %p2299_p2, %p2298_p0 }
  0x4c   : > { %p2301_p8 = pnand %p2300_p5, %p2294_p13 }
  0x4e   : > { %2304 = shalt.err (!%p2301_p8)
}
  0x4f   : > { %s3049_s10 = sld [smem:[#allocation36_spill]]  ;;  %s2316_s2 = scalar_lea.vmem %s672_s8, 256 }
  0x50   : > { %p2317_p9 = scmp.ne.s32.totalorder %s672_s8, %s2316_s2  ;;  %p2324_p12 = scmp.lt.s32.totalorder %s672_s8, %s672_s8 }
  0x51   : > { %p2325_p0 = scmp.lt.s32.totalorder %s2316_s2, %s2316_s2 }
  0x52   : > { %p2319_p11 = pnand %p2317_p9, %p2668_p7 }
  0x53   : > { %p2326_p13 = por %p2325_p0, %p2324_p12 }
  0x54   : > { %p2320_p10 = pneg %p2319_p11 }
  0x55   : > { %2077 = dma.hbm_to_vmem [thread:$0]  (!%p2660_p6), %s3049_s10, 256, %s634_s24, [#allocation10], %s2488_s5, %s2488_s5, %s2489_s21  }
  0x56   : > { %p2327_p2 = pnand %p2326_p13, %p2320_p10 }
  0x58   : > { %2330 = shalt.err (!%p2327_p2)
}
  0x59   : > { %s3050_s16 = sld [smem:[#allocation38_spill]]  ;;  %s1876_s22 = sadd.s32 4294967294, %s2483_s0  }
  0x5a   : > { %s55_s26 = sadd.s32 1, %s2479_s4  ;;  %s144_s25 = sadd.s32 1, %s2471_s29 }
  0x5b   : > { %p57_p7 = scmp.ge.s32.totalorder %s55_s26, 2  ;;  %p151_p5 = scmp.ne.s32.totalorder %s2471_s29, %s2467_s28 }
  0x5c   : > { %p152_p8 = scmp.eq.s32.totalorder %s2483_s0, 0  ;;  %p157_p9 = scmp.ne.s32.totalorder %s2467_s28, %s2463_s3 }
  0x5d   : > { %s3085_s26 = smov (%p57_p7, %s55_s26), 0  ;;  %p571_p10 = scmp.eq.s32.totalorder %s2646_s23, 1 }
  0x5e   : > { %3051 = sst [smem:[#allocation24_spill]] %s3085_s26  ;;  %p2734_p11 = por %p152_p8, %p151_p5 }
  0x5f   : > { %2083 = dma.hbm_to_vmem [thread:$0]  (!%p2660_p6), %s3050_s16, 256, %s672_s8, [#allocation13], %s2488_s5, %s2488_s5, %s2489_s21  }
  0x60   : > { %p2740_p6 = por %p3024_p1, %p157_p9  ;;  %s141_s5 = ssub.s32 %s2479_s4, %s3085_s26 }
  0x61   : > { %p142_p12 = scmp.eq.s32.totalorder %s141_s5, 0  ;;  %p577_p0 = scmp.eq.s32.totalorder %s1876_s22, 1 }
  0x62   : > { %p2747_p13 = por %p571_p10, %p151_p5  ;;  %p2100_p2 = scmp.lt.s32.totalorder %s2483_s0, 2 }
  0x63   : > { %s2753_s6 = scalar_select %p142_p12, %s2471_s29, %s144_s25  }
  0x64   : > { %p2755_p7 = por %p577_p0, %p157_p9  ;;  %s727_s27 = sand.u32 1, %s2471_s29  }
  0x65   : > { %3055 = sst [smem:[#allocation25_spill]] %s2753_s6  ;;  %s1885_s2 = sshll.u32 %s2479_s4, 4 }
  0x66   : > { %s3056_s7 = scalar_select %p2755_p7, 1, 0 }
  0x67   : > { %s730_s19 = scalar_lea.vmem [#allocation3], %s727_s27  ;;  %s3058_s16 = sld [smem:[#allocation30_spill]] }
  0x68   : > { %3057 = sst [smem:[#allocation26_spill]] %s3056_s7  ;;  %s737_s20 = sshll.u32 %s730_s19, 4  ;;  %s738_s20 = int_to_ptr.vmem [resolvable:$true] %s737_s20 }
  0x69   : > { %p2766_p5 = pnand %p2100_p2, %p2734_p11  ;;  %s3060_s6 = sld [smem:[#allocation32_spill]] }
  0x6a   : > { %s744_s4 = sand.u32 1, %s2483_s0   ;;  %s728_s29 = scalar_lea.sflag [#allocation4], %s727_s27 }
  0x6b   : > { %p2333_p8 = pneg %p2766_p5  ;;  %s2344_s19 = scalar_lea.vmem %s738_s20, 16 }
  0x6c   : > { %p2345_p9 = scmp.ne.s32.totalorder %s738_s20, %s2344_s19  ;;  %s2492_s10 = smov [#allocation3]  }
  0x6d   : > { %s735_s5 = scalar_lea.hbm %s3058_s16, %s1885_s2  ;;  %s2349_s12 = sshll.u32 %s2492_s10, 4  ;;  %s2350_s12 = int_to_ptr.vmem [resolvable:$false] %s2349_s12 }
  0x6e   : > { %p2347_p10 = pnand %p2345_p9, %p2333_p8  ;;  %s2351_s16 = scalar_lea.vmem %s2350_s12, 32 }
  0x6f   : > { %s2773_s7 = scalar_lea.hbm %s3060_s6, %s1885_s2  ;;  %p2352_p12 = scmp.lt.s32.totalorder %s738_s20, %s2350_s12 }
  0x70   : > { %p2348_p11 = pneg %p2347_p10  ;;  %p2353_p0 = scmp.lt.s32.totalorder %s2351_s16, %s2344_s19 }
  0x72   : > { %p2354_p2 = por %p2353_p0, %p2352_p12 }
  0x74   : > { %p2355_p4 = pnand %p2354_p2, %p2348_p11 }
  0x76   : > { %2358 = shalt.err (!%p2355_p4)
}
  0x77   : > { %2087 = dma.hbm_to_vmem [thread:$0]  (!%p2766_p5), %s735_s5, 16, %s738_s20, %s728_s29  }
  0x78   : > { %s747_s26 = scalar_lea.vmem [#allocation6], %s727_s27  ;;  %s745_s6 = scalar_lea.sflag [#allocation7], %s744_s4 }
  0x79   : > { %s754_s24 = sshll.u32 %s747_s26, 4  ;;  %s2493_s25 = smov [#allocation6]   ;;  %s755_s24 = int_to_ptr.vmem [resolvable:$true] %s754_s24 }
  0x7a   : > { %s2372_s2 = scalar_lea.vmem %s755_s24, 16  ;;  %s2377_s10 = sshll.u32 %s2493_s25, 4  ;;  %s2378_s10 = int_to_ptr.vmem [resolvable:$false] %s2377_s10 }
  0x7b   : > { %p2373_p9 = scmp.ne.s32.totalorder %s755_s24, %s2372_s2  ;;  %s2379_s19 = scalar_lea.vmem %s2378_s10, 32 }
  0x7c   : > { %p2380_p11 = scmp.lt.s32.totalorder %s755_s24, %s2378_s10  ;;  %p2381_p4 = scmp.lt.s32.totalorder %s2379_s19, %s2372_s2 }
  0x7d   : > { %p2375_p10 = pnand %p2373_p9, %p2333_p8 }
  0x7e   : > { %p2382_p12 = por %p2381_p4, %p2380_p11 }
  0x7f   : > { %p2376_p1 = pneg %p2375_p10 }
  0x81   : > { %p2383_p0 = pnand %p2382_p12, %p2376_p1 }
  0x83   : > { %2386 = shalt.err (!%p2383_p0)
}
  0x84   : > { %2090 = dma.hbm_to_vmem [thread:$0]  (!%p2766_p5), %s2773_s7, 16, %s755_s24, %s745_s6  }
  0x85   : > { %763 = sbr.rel (%p2651_p3) target bundleno = 2565 (0xa05), region = 108  ;;  %s2792_s29 = sand.u32 (!%p2651_p3), 1, %s2467_s28  }
  0x86   : > { %s766_s4 = scalar_lea.sflag (!%p2651_p3), [#allocation4], %s2792_s29  ;;  %s768_s27 = scalar_lea.vmem (!%p2651_p3), [#allocation3], %s2792_s29 }
  0x8a   : > { %2438 = dma.done.wait (%p2740_p6), %s766_s4, 16  }
  0x8b   : > { %2440 = vsyncadd (%p2740_p6), %s766_s4, 4294967280  ;;  %s773_s7 = sand.u32 1, %s2646_s23   ;;  %s776_s1 = scalar_lea.vmem [#allocation6], %s2792_s29 }
  0x8c   : > { %s774_s20 = scalar_lea.sflag [#allocation7], %s773_s7 }
  0x8d   : > { %2442 = dma.done.wait (%p2740_p6), %s774_s20, 16  }
  0x8e   : > { %2444 = vsyncadd (%p2740_p6), %s774_s20, 4294967280  ;;  %p3061_p1 = scmp.eq.s32.totalorder %s2646_s23, 0 }
  0x90   : > { %2446 = dma.done.wait (%p3061_p1), [#allocation7], 16   ;;  %p3062_p3 = pmov %p3061_p1 }
  0x91   : > { %p3063_p5 = pmov %p3061_p1 }
  0x92   : > { %2448 = vsyncadd (%p3062_p3), [#allocation7], 4294967280 }
  0x93   : > { %2450 = dma.done.wait (%p3063_p5), [#allocation10], 512   ;;  %p3064_p8 = pmov %p3061_p1 }
  0x94   : > { %p3065_p2 = pmov %p3061_p1 }
  0x95   : > { %2452 = vsyncadd (%p3064_p8), [#allocation10], 4294966784 }
  0x96   : > { %2454 = dma.done.wait (%p3065_p2), [#allocation13], 512   ;;  %p3066_p9 = pmov %p3061_p1 }
  0x97   : > { %p882_p6 = scmp.lt.s32.totalorder %s2475_s30, 1  ;;  %v2494_v0 = vmov 0.0   ;;  %vm2495_vm0 = vmmov 0   ;;  %v2169_v1 = vld [vmem:[#allocation9 + $0x8] sm:$0xff]   ;;  %s3067_s12 = sld [smem:[#allocation33_spill]]  ;;  %v2171_v3 = vld [vmem:[#allocation9] sm:$0xff]  }
  0x98   : > { %2456 = vsyncadd (%p3066_p9), [#allocation13], 4294966784  ;;  %1974 = vmatprep.subr.bf16.mxu1 %v2494_v0  ;;  %1966 = vmatprep.subr.bf16.mxu0 %v2494_v0  ;;  %s3068_s24 = sld [smem:[#allocation28_spill]]  ;;  %vm932_vm1 = vcmask 261120   ;;  %v2496_v9 = vmov 0   ;;  %vm1128_vm2 = vcmask 130048  }
  0x99   : > { %1978 = vmatprep.mubr.msk.bf16.mxu1 %vm2495_vm0, %v2494_v0  ;;  %s883_s8 = scalar_select %p882_p6, %s2475_s30, 1  ;;  %1970 = vmatprep.mubr.msk.bf16.mxu0 %vm2495_vm0, %v2494_v0  ;;  %v1901_v11 = vld [vmem:[%s3003_s9] ss:$0 sm:$0xff]  ;;  %v1897_v12 = vld [vmem:[#allocation8] ss:$0 sm:$0xff]  ;;  %vm1185_vm3 = vcmask 64512  }
  0x9a   : > { %s3069_s10 = sld [smem:[#allocation27_spill]]  ;;  %1975 = vmatpush3.bf16.msra.mxu1 %v2169_v1  ;;  %2167 = vset.pattern.permute.xlu1 %v2496_v9  ;;  %v2173_v26 = vld [vmem:[#allocation11 + $0x8] sm:$0xff]   ;;  %v2174_v27 = vld [vmem:[#allocation11] sm:$0xff]   ;;  %vm1201_vm4 = vcmask 1043456   ;;  %vm1368_vm5 = vcmask 261248   ;;  %vm1585_vm6 = vcmask 523264  }
  0x9b   : > { %s1894_s5 = sshll.u32 %s883_s8, 3  ;;  %1976 = vmatprep.subr.bf16.mxu1 %v2494_v0  ;;  %s3070_s23 = sld [smem:[#allocation29_spill]]  ;;  %2168 = vset.pattern.permute.xlu0 %v2496_v9  ;;  %v1909_v31 = vld [vmem:[%s768_s27] ss:$0 sm:$0xff] }
  0x9c   : > { %s3071_s2 = sld [smem:[#allocation31_spill]]  ;;  %v1911_v46 = vld [vmem:[%s776_s1] ss:$0 sm:$0xff]  ;;  %s1893_s8 = sshll.u32 %s2792_s29, 3 }
  0x9d   : > { %v2170_v2 = vld [vmem:[%s3067_s12 + $0x8] sm:$0xff]   ;;  %v2172_v4 = vld [vmem:[%s3067_s12] sm:$0xff]   ;;  %s3072_s20 = sld [smem:[#allocation39_spill]]  ;;  %s881_s27 = scalar_lea.vmem [#allocation15], %s1893_s8 }
  0x9e   : > { %s892_s6 = scalar_lea.vmem %s3068_s24, %s1894_s5  ;;  %1967 = vmatpush3.bf16.msra.mxu0 %v2170_v2  ;;  %1977 = vmatpush3.bf16.msra.mxu1 %v2171_v3  ;;  %v1905_v3 = vld [vmem:[%s3005_s11] ss:$0 sm:$0xff]  ;;  %s3073_s16 = sld [smem:[#allocation40_spill]] }
  0x9f   : > { %1968 = vmatprep.subr.bf16.mxu0 %v2494_v0  ;;  %v906_v5 = vld [vmem:[%s892_s6] sm:$0xff]  ;;  %1990 = vmatprep.subr.bf16.mxu1 %v2494_v0  ;;  %s3074_s24 = sld [smem:[#allocation41_spill]]  ;;  %s1935_s6 = sshll.u32 %s2475_s30, 7 }
  0xa0   : > { %s888_s19 = scalar_lea.vmem %s3069_s10, %s1894_s5  ;;  %v908_v7 = vpack.c.bf16 %v906_v5, %v906_v5  ;;  %s1675_s25 = sshll.u32 %s881_s27, 4  ;;  %s1676_s25 = int_to_ptr.vmem [resolvable:$true] %s1675_s25 }
  0xa1   : > { %v2840_v6 = vld [vmem:[%s888_s19] sm:$0xff]  ;;  %s899_s22 = scalar_lea.vmem %s3070_s23, %s1894_s5  ;;  %s2497_s5 = smov 112  }
  0xa2   : > { %v907_v8 = vpack.c.bf16 %v2840_v6, %v2840_v6  ;;  %1969 = vmatpush3.bf16.msra.mxu0 %v2172_v4  ;;  %1979 = vmatmul.mubr.msk.bf16.vlgmr.msra.gmra.mxu1 %vm932_vm1, %v908_v7  ;;  %v1108_v10 = vld [vmem:[%s899_s22] sm:$0xff]  ;;  %v1914_v53 = vld [vmem:[%s3071_s2 + $0x8] sm:$0xff]  ;;  %s2498_s19 = smov 16   ;;  %s1661_s7 = scalar_lea.sflag [#allocation5], %s2792_s29 }
  0xa3   : > { %1982 = vmatprep.subr.bf16.mxu0 %v2494_v0  ;;  %1992 = vmatprep.mubr.msk.bf16.mxu1 %vm2495_vm0, %v2494_v0  ;;  %v1176_v43 = vld [vmem:[%s3071_s2] sm:$0xff]  ;;  %s2499_s23 = smov [#allocation15]  }
  0xa4   : > { %1111 = vperm.xlu1 %2167, %v1108_v10   ;;  %s2391_s22 = sshll.u32 %s2499_s23, 4  ;;  %s2392_s22 = int_to_ptr.vmem [resolvable:$false] %s2391_s22 }
  0xa5   : > { %1971 = vmatmul.mubr.msk.bf16.vlgmr.msra.gmra.mxu0 %vm932_vm1, %v907_v8  ;;  %s2393_s30 = scalar_lea.vmem %s2392_s22, 256  ;;  %p2394_p12 = scmp.lt.s32.totalorder %s1676_s25, %s2392_s22 }
  0xa6   : > { %1986 = vmatprep.mubr.msk.bf16.mxu0 %vm2495_vm0, %v2494_v0  ;;  %1983 = vmatpush3.bf16.msra.mxu0 %v2173_v26 }
  0xa7   : > { %1984 = vmatprep.subr.bf16.mxu0 %v2494_v0 }
  0xaa   : > { %1985 = vmatpush3.bf16.msra.mxu0 %v2174_v27 }
  0xab   : > { %1996 = vmatprep.subr.bf16.mxu0 %v2494_v0 }
  0xad   : > { %1987 = vmatmul.mubr.msk.bf16.vlgmr.msra.gmra.mxu0 %vm932_vm1, %v908_v7 }
  0xae   : > { %1998 = vmatprep.mubr.msk.bf16.mxu0 %vm2495_vm0, %v2494_v0 }
 0x11f   : > { %v1112_v32 = vpop.permute.xlu1 %1111 }
 0x120   : > { %v1117_v33 = vsub.s32 %v1112_v32, %v1909_v31  ;;  %v2175_v31 = vld [vmem:[#allocation12 + $0x8] sm:$0xff]   ;;  %v2176_v32 = vld [vmem:[#allocation12] sm:$0xff]  }
 0x122   : > { %v1118_v34 = vcvt.s32.f32 %v1117_v33 }
 0x124   : > { %v1119_v35 = vmul.f32 1.6666667e-05, %v1118_v34 }
 0x126   : > { %v1120_v36 = vmax.f32 %v1119_v35, 0.0 }
 0x128   : > { %v1121_v37 = vadd.f32 1.0, %v1120_v36 }
 0x12a   : > { %2183 = vrcp.f32 %v1121_v37 }
 0x137   : > { %v2184_v38 = vpop.eup %2183 }
 0x138   : > { %v1124_v39 = vsub.f32 4.0, %v2184_v38 }
 0x13a   : > { %v1125_v40 = vadd.f32 1.0, %v1124_v39 }
 0x13c   : > { %2185 = vrcp.f32 %v1125_v40  ;;  %v1916_v40 = vld [vmem:[%s3007_s13] ss:$0 sm:$0xff] }
 0x149   : > { %v2186_v41 = vpop.eup %2185 }
 0x162   : > { %v1036_v13 = vpop.f32.mrf.mxu1 }
 0x163   : > { %v1037_v14 = vadd.f32 %v1901_v11, %v1036_v13 }
 0x164   : > { %v1980_v16 = vpop.f32.mrf.mxu1 }
 0x165   : > { %v970_v15 = vpop.f32.mrf.mxu0  ;;  %v1106_v18 = vpack.c.bf16 %v1037_v14, %v1037_v14 }
 0x166   : > { %v971_v17 = vadd.f32 %v1897_v12, %v970_v15  ;;  %v1039_v20 = vpop.f32.mrf.mxu1 }
 0x167   : > { %v1972_v19 = vpop.f32.mrf.mxu0  ;;  %v1133_v21 = vsel %vm1128_vm2, %v1106_v18, 0  ;;  %1250 = vrot.lane.b32.xlu0 %v1106_v18, %s2497_s5 }
 0x168   : > { %v1105_v22 = vpack.c.bf16 %v971_v17, %v971_v17  ;;  %v1981_v24 = vpop.f32.mrf.mxu1  ;;  %1991 = vmatpush3.bf16.xpose.msra.mxu1 %v1133_v21 }
 0x169   : > { %v973_v23 = vpop.f32.mrf.mxu0  ;;  %2002 = vmatprep.subr.bf16.mxu1 %v2494_v0 }
 0x16b   : > { %v1973_v25 = vpop.f32.mrf.mxu0  ;;  %1247 = vrot.lane.b32.xlu0 %v1105_v22, %s2497_s5 }
 0x16d   : > { %v1099_v4 = vpop.f32.mrf.mxu0 }
 0x16e   : > { %v1100_v5 = vadd.f32 %v1905_v3, %v1099_v4  ;;  %v2181_v3 = vld [vmem:[%s3012_s18 + $0x8] sm:$0xff]   ;;  %v2182_v4 = vld [vmem:[%s3012_s18] sm:$0xff]  }
 0x16f   : > { %1993 = vmatmul.mubr.msk.bf16.vlgmr.msra.gmra.mxu1 %vm1128_vm2, %v1105_v22  ;;  %v1988_v7 = vpop.f32.mrf.mxu0 }
 0x170   : > { %2004 = vmatprep.mubr.msk.bf16.mxu1 %vm2495_vm0, %v2494_v0  ;;  %v1107_v8 = vpack.c.bf16 %v1100_v5, %v1100_v5  ;;  %v1922_v5 = vld [vmem:[%s3011_s17] ss:$0 sm:$0xff] }
 0x171   : > { %v1102_v9 = vpop.f32.mrf.mxu0 }
 0x172   : > { %v1203_v10 = vsel %vm1201_vm4, %v1107_v8, 0 }
 0x173   : > { %v1989_v11 = vpop.f32.mrf.mxu0  ;;  %1997 = vmatpush3.bf16.msra.mxu0 %v1203_v10 }
 0x174   : > { %2008 = vmatprep.subr.bf16.mxu0 %v2494_v0 }
 0x1d9   : > { %v1251_v28 = vpop.permute.xlu0 %1250 }
 0x1da   : > { %v1256_v29 = vsel %vm1128_vm2, %v1251_v28, 0 }
 0x1db   : > { %2003 = vmatpush3.bf16.xpose.msra.mxu1 %v1256_v29 }
 0x1dc   : > { %2014 = vmatprep.subr.bf16.mxu1 %v2494_v0 }
 0x1dd   : > { %v1248_v30 = vpop.permute.xlu0 %1247 }
 0x1e2   : > { %2005 = vmatmul.mubr.msk.bf16.vlgmr.msra.gmra.mxu1 %vm1128_vm2, %v1248_v30 }
 0x1e3   : > { %2018 = vmatprep.mubr.msk.bf16.mxu1 %vm2495_vm0, %v2494_v0  ;;  %2015 = vmatpush3.bf16.msra.mxu1 %v2175_v31 }
 0x1e4   : > { %2016 = vmatprep.subr.bf16.mxu1 %v2494_v0 }
 0x1e7   : > { %2017 = vmatpush3.bf16.msra.mxu1 %v2176_v32 }
 0x1e8   : > { %2030 = vmatprep.subr.bf16.mxu1 %v2494_v0 }
 0x22f   : > { %v1169_v42 = vpop.f32.mrf.mxu1 }
 0x230   : > { %v1175_v44 = vmul.f32 %v2186_v41, %v1169_v42 }
 0x231   : > { %v1994_v45 = vpop.f32.mrf.mxu1 }
 0x232   : > { %v1177_v47 = vadd.f32 %v1176_v43, %v1175_v44 }
 0x233   : > { %v1172_v48 = vpop.f32.mrf.mxu1 }
 0x234   : > { %v1184_v49 = vadd.f32 %v1911_v46, %v1177_v47 }
 0x235   : > { %v1995_v50 = vpop.f32.mrf.mxu1 }
 0x236   : > { %v1186_v51 = vsel %vm1185_vm3, %v1184_v49, -inf }
 0x237   : > { %1187 = vmax.xlane.f32.xlu1 %v1186_v51 }
 0x2a2   : > { %v1292_v52 = vpop.f32.mrf.mxu1 }
 0x2a3   : > { %v1298_v54 = vmul.f32 %v2186_v41, %v1292_v52 }
 0x2a4   : > { %v2006_v55 = vpop.f32.mrf.mxu1 }
 0x2a5   : > { %v1301_v56 = vadd.f32 %v1914_v53, %v1298_v54  ;;  %v2177_v53 = vld [vmem:[#allocation14 + $0x8] sm:$0xff]   ;;  %v2178_v54 = vld [vmem:[#allocation14] sm:$0xff]  }
 0x2a6   : > { %v1295_v57 = vpop.f32.mrf.mxu1 }
 0x2a7   : > { %v1302_v58 = vadd.f32 %v1911_v46, %v1301_v56 }
 0x2a8   : > { %v2007_v59 = vpop.f32.mrf.mxu1 }
 0x2a9   : > { %v1303_v60 = vsel %vm1185_vm3, %v1302_v58, -inf }
 0x2aa   : > { %1304 = vmax.xlane.f32.xlu0 %v1303_v60  ;;  %v1921_v60 = vld [vmem:[%s3009_s15] ss:$0 sm:$0xff] }
 0x2c0   : > { %v1188_v61 = vpop.xlane.xlu1 %1187 }
 0x2c1   : > { %v1189_v62 = vsub.f32 %v1184_v49, %v1188_v61 }
 0x2c3   : > { %v1190_v63 = vmul.f32 1.442695, %v1189_v62 }
 0x2c5   : > { %2187 = vpow2.f32 %v1190_v63 }
 0x2d2   : > { %v2188_v1 = vpop.eup %2187 }
 0x2d3   : > { %v1192_v2 = vsel %vm1185_vm3, %v2188_v1, 0.0 }
 0x2d4   : > { %1193 = vadd.xlane.f32.xlu0 %v1192_v2  ;;  %v2180_v2 = vld [vmem:[%s3012_s18 + $0x10] sm:$0xff]  }
 0x2ea   : > { %1316 = vrot.lane.b32.xlu0 %v1107_v8, %s2497_s5 }
 0x333   : > { %v1305_v12 = vpop.xlane.xlu0 %1304 }
 0x334   : > { %v1306_v13 = vsub.f32 %v1302_v58, %v1305_v12  ;;  %v1920_v58 = vld [vmem:[%s3008_s14] ss:$0 sm:$0xff] }
 0x336   : > { %v1307_v14 = vmul.f32 1.442695, %v1306_v13 }
 0x338   : > { %2189 = vpow2.f32 %v1307_v14 }
 0x345   : > { %v2190_v15 = vpop.eup %2189 }
 0x346   : > { %v1309_v16 = vsel %vm1185_vm3, %v2190_v15, 0.0 }
 0x347   : > { %1310 = vadd.xlane.f32.xlu1 %v1309_v16 }
 0x35d   : > { %v1194_v17 = vpop.xlane.xlu0 %1193 }
 0x35e   : > { %2191 = vrcp.f32 %v1194_v17 }
 0x361   : > { %v1317_v19 = vpop.permute.xlu0 %1316 }
 0x362   : > { %v1322_v22 = vsel %vm1201_vm4, %v1317_v19, 0 }
 0x36b   : > { %v2192_v18 = vpop.eup %2191 }
 0x36c   : > { %v1196_v20 = vmul.f32 %v2192_v18, %v2188_v1  ;;  %v2179_v1 = vld [vmem:[%s3012_s18 + $0x18] sm:$0xff]  }
 0x36e   : > { %v1197_v21 = vpack.c.bf16 %v1196_v20, %v1196_v20 }
 0x370   : > { %1999 = vmatmul.mubr.msk.bf16.vlgmr.msra.gmra.mxu0 %vm1185_vm3, %v1197_v21  ;;  %v1926_v21 = vld [vmem:[%s3072_s20] ss:$0 sm:$0xff]  ;;  %s2387_s20 = scalar_lea.vmem %s1676_s25, 128 }
 0x371   : > { %2009 = vmatpush3.bf16.msra.mxu0 %v1322_v22  ;;  %2010 = vmatprep.mubr.msk.bf16.mxu0 %vm2495_vm0, %v2494_v0  ;;  %p2388_p10 = scmp.ne.s32.totalorder %s1676_s25, %s2387_s20  ;;  %p2395_p0 = scmp.lt.s32.totalorder %s2393_s30, %s2387_s20 }
 0x372   : > { %2022 = vmatprep.subr.bf16.mxu0 %v2494_v0 }
 0x373   : > { %p2389_p11 = pnand %p2388_p10, %p2747_p13  ;;  %p2396_p1 = por %p2395_p0, %p2394_p12 }
 0x375   : > { %p2390_p4 = pneg %p2389_p11 }
 0x377   : > { %p2397_p3 = pnand %p2396_p1, %p2390_p4 }
 0x3d0   : > { %v1311_v23 = vpop.xlane.xlu1 %1310 }
 0x3d1   : > { %2193 = vrcp.f32 %v1311_v23 }
 0x3de   : > { %v2194_v24 = vpop.eup %2193 }
 0x3df   : > { %v1313_v25 = vmul.f32 %v2194_v24, %v2190_v15 }
 0x3e1   : > { %v1314_v26 = vpack.c.bf16 %v1313_v25, %v1313_v25 }
 0x3e3   : > { %2011 = vmatmul.mubr.msk.bf16.vlgmr.msra.gmra.mxu0 %vm1185_vm3, %v1314_v26 }
 0x3e4   : > { %2026 = vmatprep.mubr.msk.bf16.mxu0 %vm2495_vm0, %v2494_v0  ;;  %2023 = vmatpush3.bf16.msra.mxu0 %v2177_v53 }
 0x3e5   : > { %2024 = vmatprep.subr.bf16.mxu0 %v2494_v0 }
 0x3e8   : > { %2025 = vmatpush3.bf16.msra.mxu0 %v2178_v54 }
 0x430   : > { %v1239_v27 = vpop.f32.mrf.mxu0 }
 0x431   : > { %1245 = vst.msk [vmem:[#allocation2] sm:$0xff] %vm1128_vm2, %v1239_v27 }
 0x432   : > { %v2000_v28 = vpop.f32.mrf.mxu0 }
 0x434   : > { %v1242_v29 = vpop.f32.mrf.mxu0 }
 0x436   : > { %v2001_v30 = vpop.f32.mrf.mxu0 }
 0x4a3   : > { %v1358_v33 = vpop.f32.mrf.mxu0 }
 0x4a4   : > { %1365 = vrot.lane.b32.xlu1 %v1358_v33, %s2498_s19  ;;  %s3075_s19 = sld [smem:[#allocation42_spill]] }
 0x4a5   : > { %v2012_v34 = vpop.f32.mrf.mxu0 }
 0x4a7   : > { %v1361_v35 = vpop.f32.mrf.mxu0 }
 0x4a9   : > { %v2013_v36 = vpop.f32.mrf.mxu0 }
 0x4aa   : > { %s1673_s4 = scalar_lea.hbm %s3075_s19, %s1935_s6 }
 0x516   : > { %v1366_v37 = vpop.permute.xlu1 %1365 }
 0x517   : > { %1369 = vst.msk [vmem:[#allocation2] sm:$0xff] %vm1368_vm5, %v1366_v37 }
 0x51e   : > { %v1370_v38 = vld [vmem:[#allocation2] sm:$0xff] }
 0x51f   : > { %v1371_v39 = vpack.c.bf16 %v1370_v38, %v1370_v38  ;;  %v1932_v38 = vld [vmem:[%s3073_s16] ss:$0 sm:$0xff] }
 0x521   : > { %2019 = vmatmul.mubr.msk.bf16.vlgmr.msra.gmra.mxu1 %vm932_vm1, %v1371_v39 }
 0x522   : > { %2038 = vmatprep.mubr.msk.bf16.mxu1 %vm2495_vm0, %v2494_v0  ;;  %2031 = vmatpush3.bf16.msra.mxu1 %v2179_v1 }
 0x523   : > { %2032 = vmatprep.subr.bf16.mxu1 %v2494_v0 }
 0x526   : > { %2033 = vmatpush3.bf16.msra.mxu1 %v2180_v2 }
 0x527   : > { %2034 = vmatprep.subr.bf16.mxu1 %v2494_v0 }
 0x52a   : > { %2035 = vmatpush3.bf16.msra.mxu1 %v2181_v3 }
 0x52b   : > { %2036 = vmatprep.subr.bf16.mxu1 %v2494_v0 }
 0x52e   : > { %2037 = vmatpush3.bf16.msra.mxu1 %v2182_v4 }
 0x5e1   : > { %v1432_v41 = vpop.f32.mrf.mxu1 }
 0x5e2   : > { %v1433_v42 = vadd.f32 %v1916_v40, %v1432_v41  ;;  %v1933_v40 = vld [vmem:[%s3074_s24] ss:$0 sm:$0xff] }
 0x5e3   : > { %v2020_v43 = vpop.f32.mrf.mxu1 }
 0x5e4   : > { %v1438_v44 = vadd.f32 %v1433_v42, %v2840_v6 }
 0x5e5   : > { %v1435_v45 = vpop.f32.mrf.mxu1 }
 0x5e6   : > { %v1441_v46 = vsel %vm932_vm1, %v1438_v44, 0.0 }
 0x5e7   : > { %1442 = vadd.xlane.f32.xlu1 %v1441_v46  ;;  %v2021_v47 = vpop.f32.mrf.mxu1 }
 0x670   : > { %v1443_v48 = vpop.xlane.xlu1 %1442 }
 0x671   : > { %v1445_v49 = vmul.f32 0.03125, %v1443_v48 }
 0x673   : > { %v1446_v50 = vsub.f32 %v1438_v44, %v1445_v49 }
 0x675   : > { %v1447_v51 = vmul.f32 %v1446_v50, %v1446_v50 }
 0x677   : > { %v1448_v52 = vsel %vm932_vm1, %v1447_v51, 0.0 }
 0x678   : > { %1449 = vadd.xlane.f32.xlu0 %v1448_v52 }
 0x701   : > { %v1450_v55 = vpop.xlane.xlu0 %1449 }
 0x702   : > { %v1451_v6 = vmul.f32 0.03125, %v1450_v55 }
 0x704   : > { %v1452_v56 = vadd.f32 1e-12, %v1451_v6 }
 0x706   : > { %2195 = vrsqrt.f32 %v1452_v56 }
 0x713   : > { %v2196_v57 = vpop.eup %2195 }
 0x714   : > { %v1454_v59 = vmul.f32 %v2196_v57, %v1446_v50 }
 0x716   : > { %v1461_v61 = vmul.f32 %v1920_v58, %v1454_v59 }
 0x718   : > { %v1468_v62 = vadd.f32 %v1921_v60, %v1461_v61 }
 0x71a   : > { %v1469_v63 = vpack.c.bf16 %v1468_v62, %v1468_v62 }
 0x71c   : > { %2027 = vmatmul.mubr.msk.bf16.vlgmr.msra.gmra.mxu0 %vm932_vm1, %v1469_v63 }
 0x7dc   : > { %v1530_v7 = vpop.f32.mrf.mxu0 }
 0x7dd   : > { %v1531_v8 = vadd.f32 %v1922_v5, %v1530_v7 }
 0x7de   : > { %v2028_v9 = vpop.f32.mrf.mxu0 }
 0x7df   : > { %v1536_v10 = vmul.f32 %v1531_v8, %v1531_v8 }
 0x7e0   : > { %v1533_v11 = vpop.f32.mrf.mxu0 }
 0x7e1   : > { %v1537_v12 = vmul.f32 %v1536_v10, %v1531_v8 }
 0x7e2   : > { %v2029_v13 = vpop.f32.mrf.mxu0 }
 0x7e3   : > { %v1538_v14 = vmul.f32 0.044715, %v1537_v12 }
 0x7e5   : > { %v1539_v15 = vadd.f32 %v1538_v14, %v1531_v8 }
 0x7e7   : > { %v1540_v16 = vmul.f32 0.7978846, %v1539_v15 }
 0x7e9   : > { %2197 = vtanh.f32 %v1540_v16 }
 0x7f6   : > { %v2198_v0 = vpop.eup %2197 }
 0x7f7   : > { %v1542_v17 = vadd.f32 1.0, %v2198_v0 }
 0x7f9   : > { %v1543_v18 = vmul.f32 0.5, %v1542_v17 }
 0x7fb   : > { %v1544_v19 = vmul.f32 %v1543_v18, %v1531_v8 }
 0x7fd   : > { %v1545_v20 = vpack.c.bf16 %v1544_v19, %v1544_v19 }
 0x7ff   : > { %2039 = vmatmul.mubr.msk.bf16.vlgmr.msra.gmra.mxu1 %vm1585_vm6, %v1545_v20 }
 0x8bf   : > { %v1623_v22 = vpop.f32.mrf.mxu1 }
 0x8c0   : > { %v1624_v23 = vadd.f32 %v1926_v21, %v1623_v22 }
 0x8c1   : > { %v2040_v24 = vpop.f32.mrf.mxu1 }
 0x8c2   : > { %v1629_v25 = vadd.f32 %v1624_v23, %v1468_v62 }
 0x8c3   : > { %v1626_v26 = vpop.f32.mrf.mxu1 }
 0x8c4   : > { %v1632_v27 = vsel %vm932_vm1, %v1629_v25, 0.0 }
 0x8c5   : > { %1633 = vadd.xlane.f32.xlu0 %v1632_v27  ;;  %v2041_v28 = vpop.f32.mrf.mxu1 }
 0x94e   : > { %v1634_v29 = vpop.xlane.xlu0 %1633 }
 0x94f   : > { %v1635_v30 = vmul.f32 0.03125, %v1634_v29 }
 0x951   : > { %v1636_v31 = vsub.f32 %v1629_v25, %v1635_v30 }
 0x953   : > { %v1637_v32 = vmul.f32 %v1636_v31, %v1636_v31 }
 0x955   : > { %v1638_v33 = vsel %vm932_vm1, %v1637_v32, 0.0 }
 0x956   : > { %1639 = vadd.xlane.f32.xlu1 %v1638_v33 }
 0x9df   : > { %v1640_v34 = vpop.xlane.xlu1 %1639 }
 0x9e0   : > { %v1641_v35 = vmul.f32 0.03125, %v1640_v34 }
 0x9e2   : > { %v1642_v36 = vadd.f32 1e-12, %v1641_v35 }
 0x9e4   : > { %2199 = vrsqrt.f32 %v1642_v36 }
 0x9f1   : > { %v2200_v37 = vpop.eup %2199 }
 0x9f2   : > { %v1644_v39 = vmul.f32 %v2200_v37, %v1636_v31 }
 0x9f4   : > { %v1651_v41 = vmul.f32 %v1932_v38, %v1644_v39 }
 0x9f6   : > { %v1658_v42 = vadd.f32 %v1933_v40, %v1651_v41 }
 0x9f8   : > { %1659 = vst.msk [vmem:[%s881_s27] sm:$0xff] %vm932_vm1, %v1658_v42 }
 0x9f9   : > { %2400 = shalt.err (!%p2397_p3)
}
 0x9fa   : > { %s2401_s8 = scalar_lea.hbm %s1673_s4, 128  ;;  %s2405_s26 = scalar_lea.hbm %s3075_s19, 256 }
 0x9fb   : > { %p2402_p5 = scmp.ne.s32.totalorder %s1673_s4, %s2401_s8  ;;  %p2406_p9 = scmp.lt.s32.totalorder %s1673_s4, %s3075_s19 }
 0x9fc   : > { %p2407_p6 = scmp.lt.s32.totalorder %s2405_s26, %s2401_s8 }
 0x9fd   : > { %p2403_p8 = pnand %p2402_p5, %p2747_p13 }
 0x9fe   : > { %p2408_p10 = por %p2407_p6, %p2406_p9 }
 0x9ff   : > { %p2404_p2 = pneg %p2403_p8 }
 0xa01   : > { %p2409_p11 = pnand %p2408_p10, %p2404_p2 }
 0xa03   : > { %2412 = shalt.err (!%p2409_p11)
}
 0xa04   : > { %2066 = dma.vmem_to_hbm [thread:$0]  (%p2747_p13), %s1676_s25, 128, %s1673_s4, %s1661_s7  }
 0xa05 PF: > { %s1687_s27 = sand.u32 1, %s2463_s3   ;;  %p3077_p4 = scmp.ge.s32.totalorder %s2483_s0, 2 }
 0xa06   : > { %s1688_s1 = scalar_lea.sflag [#allocation5], %s1687_s27 }
 0xa07   : > { %p2092_p12 = pnand %p3077_p4, %p2755_p7 }
 0xa09   : > { %p2093_p0 = pneg %p2092_p12 }
 0xa0b   : > { %2458 = dma.done.wait (%p2093_p0), %s1688_s1, 128  }
 0xa0c   : > { %2460 = vsyncadd (%p2093_p0), %s1688_s1, 4294967168  ;;  %s43_s0 = sadd.s32 1, %s2483_s0   ;;  %s3078_s10 = sld [smem:[#allocation22_spill]] }
 0xa0d   : > { %p40_p1 = scmp.ge.s32.totalorder %s43_s0, 4   ;;  %s3079_s29 = sld [smem:[#allocation25_spill]] }
 0xa0e   : > { %s3080_s30 = sld [smem:[#allocation23_spill]]  ;;  %s3082_s3 = smov %s2467_s28 }
 0xa0f   : > { %s3081_s4 = sld [smem:[#allocation24_spill]]  ;;  %42 = sbr.rel (!%p40_p1) target bundleno = 27 (0x1b), region = 199 }
 0xa12   : > { %s3083_s28 = smov %s3078_s10 }
 0xa14   :  { %1693 = vsyncpa [#allocation4], 1 }
 0xa15   :  { %1695 = vsyncpa [#allocation4 + $0x1], 1 }
 0xa16   :  { %1696 = vsyncpa [#allocation7], 1 }
 0xa17   :  { %1698 = vsyncpa [#allocation7 + $0x1], 1 }
 0xa18   :  { %1699 = vsyncpa [#allocation10], 1 }
 0xa19   :  { %1700 = vsyncpa [#allocation13], 1 }
 0xa1a   :  { %1701 = vsyncpa [#allocation5], 1 }
 0xa1b   :  { %1703 = vsyncpa [#allocation5 + $0x1], 1 }

// kernel: tpu_custom_call.1
= control target key start
LH: loop header
LB: loop body
LE: loop exit
PB: predicated region body
PF: predicated region fallthrough
CT: control target
= control target key end

     0   :  { %s2994_s0 = inlined_call_operand.vmem [shape: f32[2,8,32], index: 0, kind: input, shape index: {}]   ;;  %s2995_s1 = inlined_call_operand.vmem [shape: f32[2,8,32], index: 1, kind: input, shape index: {}]   ;;  %s2996_s2 = inlined_call_operand.vmem [shape: s32[2,8,1], index: 2, kind: input, shape index: {}]   ;;  %s2997_s3 = inlined_call_operand.hbm [shape: s32[2,1,8], index: 3, kind: input, shape index: {}]   ;;  %s2998_s4 = inlined_call_operand.vmem [shape: f32[2,8,8], index: 4, kind: input, shape index: {}]   ;;  %s2999_s5 = inlined_call_operand.hbm [shape: f32[2,1,8], index: 5, kind: input, shape index: {}]   ;;  %s3000_s6 = inlined_call_operand.vmem [shape: bf16[32,32], index: 6, kind: input, shape index: {}]   ;;  %s3001_s7 = inlined_call_operand.hbm [shape: f32[1,32], index: 7, kind: input, shape index: {}]   ;;  %s3002_s8 = inlined_call_operand.hbm [shape: bf16[32,32], index: 8, kind: input, shape index: {}]   ;;  %s3003_s9 = inlined_call_operand.vmem [shape: f32[1,32], index: 9, kind: input, shape index: {}]   ;;  %s3004_s10 = inlined_call_operand.hbm [shape: bf16[32,32], index: 10, kind: input, shape index: {}]   ;;  %s3005_s11 = inlined_call_operand.vmem [shape: f32[1,32], index: 11, kind: input, shape index: {}]   ;;  %s3006_s12 = inlined_call_operand.hbm [shape: bf16[32,32], index: 12, kind: input, shape index: {}]   ;;  %s3007_s13 = inlined_call_operand.vmem [shape: f32[1,32], index: 13, kind: input, shape index: {}]   ;;  %s3008_s14 = inlined_call_operand.vmem [shape: f32[1,32], index: 14, kind: input, shape index: {}]   ;;  %s3009_s15 = inlined_call_operand.vmem [shape: f32[1,32], index: 15, kind: input, shape index: {}]   ;;  %s3010_s16 = inlined_call_operand.hbm [shape: bf16[32,64], index: 16, kind: input, shape index: {}]   ;;  %s3011_s17 = inlined_call_operand.vmem [shape: f32[1,64], index: 17, kind: input, shape index: {}]   ;;  %s3012_s18 = inlined_call_operand.vmem [shape: bf16[64,32], index: 18, kind: input, shape index: {}]   ;;  %s3013_s19 = inlined_call_operand.vmem [shape: f32[1,32], index: 19, kind: input, shape index: {}]   ;;  %s3014_s20 = inlined_call_operand.vmem [shape: f32[1,32], index: 20, kind: input, shape index: {}]   ;;  %s3015_s21 = inlined_call_operand.vmem [shape: f32[1,32], index: 21, kind: input, shape index: {}]   ;;  %s3016_s22 = inlined_call_operand.hbm [shape: f32[2,8,32], index: 22, kind: output, shape index: {}]  }
   0x1   :  { %3025 = sst [smem:[#allocation27_spill]] %s2994_s0 }
   0x2   :  { %3026 = sst [smem:[#allocation28_spill]] %s2995_s1 }
   0x3   :  { %3027 = sst [smem:[#allocation29_spill]] %s2996_s2 }
   0x4   :  { %3028 = sst [smem:[#allocation30_spill]] %s2997_s3 }
   0x5   :  { %3029 = sst [smem:[#allocation31_spill]] %s2998_s4 }
   0x6   :  { %3030 = sst [smem:[#allocation32_spill]] %s2999_s5 }
   0x7   :  { %3031 = sst [smem:[#allocation33_spill]] %s3000_s6 }
   0x8   :  { %3032 = sst [smem:[#allocation34_spill]] %s3001_s7 }
   0x9   :  { %3033 = sst [smem:[#allocation35_spill]] %s3002_s8 }
   0xa   :  { %3034 = sst [smem:[#allocation36_spill]] %s3004_s10 }
   0xb   :  { %3035 = sst [smem:[#allocation37_spill]] %s3006_s12 }
   0xc   :  { %3036 = sst [smem:[#allocation38_spill]] %s3010_s16 }
   0xd   :  { %3037 = sst [smem:[#allocation39_spill]] %s3013_s19 }
   0xe   :  { %3038 = sst [smem:[#allocation40_spill]] %s3014_s20 }
   0xf   :  { %3039 = sst [smem:[#allocation41_spill]] %s3015_s21 }
  0x10   :  { %3040 = sst [smem:[#allocation42_spill]] %s3016_s22 }
  0x11   :  { %27 = vsyncpa [#allocation4], 0 }
  0x12   :  { %29 = vsyncpa [#allocation4 + $0x1], 0 }
  0x13   :  { %30 = vsyncpa [#allocation7], 0 }
  0x14   :  { %32 = vsyncpa [#allocation7 + $0x1], 0 }
  0x15   :  { %33 = vsyncpa [#allocation10], 0 }
  0x16   :  { %34 = vsyncpa [#allocation13], 0 }
  0x17   :  { %35 = vsyncpa [#allocation5], 0 }
  0x18   :  { %37 = vsyncpa [#allocation5 + $0x1], 0  ;;  %s2615_s3 = smov 0   ;;  %s2617_s28 = smov 0  }
  0x19   :  { %s2619_s29 = smov 0   ;;  %s2621_s30 = smov 0  }
  0x1a   :  { %s2623_s4 = smov 0   ;;  %s2625_s0 = smov 0  }
  0x1b LB: > { %3041 = sst [smem:[#allocation22_spill]] %s2471_s29  ;;  %s2646_s23 = sadd.s32 4294967295, %s2483_s0   ;;  %s2483_s0 = sphi %s2625_s0, %s43_s0   ;;  %s2479_s4 = sphi %s2623_s4, %s3081_s4   ;;  %s2475_s30 = sphi %s2621_s30, %s3080_s30   ;;  %s2471_s29 = sphi %s2619_s29, %s3079_s29   ;;  %s2467_s28 = sphi %s2617_s28, %s3083_s28   ;;  %s2463_s3 = sphi %s2615_s3, %s3082_s3  }
  0x1c   : > { %3042 = sst [smem:[#allocation23_spill]] %s2479_s4  ;;  %p1877_p0 = scmp.ge.s32.totalorder %s2483_s0, 1 }
  0x1d   : > { %p3024_p1 = scmp.eq.s32.totalorder %s2646_s23, 0  ;;  %p584_p2 = scmp.lt.s32.totalorder %s2483_s0, 3 }
  0x1e   : > { %s2485_s5 = smov [#allocation8]   ;;  %s2486_s6 = smov [#allocation9]  }
  0x1f   : > { %p2651_p3 = pnand %p1877_p0, %p584_p2  ;;  %s607_s24 = sshll.u32 %s2485_s5, 4  ;;  %s608_s24 = int_to_ptr.vmem [resolvable:$true] %s607_s24 }
  0x20   : > { %s617_s25 = sshll.u32 %s2486_s6, 4  ;;  %s2487_s2 = smov [#allocation12]   ;;  %s2664_s25 = int_to_ptr.vmem [resolvable:$true] %s617_s25 }
  0x21   : > { %p2068_p5 = pneg %p2651_p3  ;;  %s649_s27 = sshll.u32 %s2487_s2, 4  ;;  %s650_s27 = int_to_ptr.vmem [resolvable:$true] %s649_s27 }
  0x22   : > { %s2212_s5 = scalar_lea.vmem %s608_s24, 16  ;;  %s2219_s6 = scalar_lea.vmem %s608_s24, 32 }
  0x23   : > { %p2660_p6 = pnand %p2068_p5, %p3024_p1  ;;  %p2213_p8 = scmp.ne.s32.totalorder %s608_s24, %s2212_s5 }
  0x24   : > { %p2220_p11 = scmp.lt.s32.totalorder %s608_s24, %s608_s24  ;;  %p2221_p12 = scmp.lt.s32.totalorder %s2219_s6, %s2212_s5 }
  0x25   : > { %p2668_p7 = pneg %p2660_p6 }
  0x26   : > { %p2222_p13 = por %p2221_p12, %p2220_p11 }
  0x27   : > { %p2215_p9 = pnand %p2213_p8, %p2668_p7 }
  0x29   : > { %p2216_p10 = pneg %p2215_p9 }
  0x2b   : > { %p2223_p0 = pnand %p2222_p13, %p2216_p10 }
  0x2d   : > { %2226 = shalt.err (!%p2223_p0)
}
  0x2e   : > { %s3046_s7 = sld [smem:[#allocation34_spill]]  ;;  %s2238_s20 = scalar_lea.vmem %s2664_s25, 256 }
  0x2f   : > { %p2239_p2 = scmp.ne.s32.totalorder %s2664_s25, %s2238_s20  ;;  %p2246_p9 = scmp.lt.s32.totalorder %s2664_s25, %s2664_s25 }
  0x30   : > { %p2247_p11 = scmp.lt.s32.totalorder %s2238_s20, %s2238_s20 }
  0x31   : > { %p2241_p5 = pnand %p2239_p2, %p2668_p7 }
  0x32   : > { %p2248_p10 = por %p2247_p11, %p2246_p9 }
  0x33   : > { %p2242_p8 = pneg %p2241_p5 }
  0x34   : > { %2071 = dma.hbm_to_vmem [thread:$0]  (!%p2660_p6), %s3046_s7, 16, %s608_s24, [#allocation7]  }
  0x35   : > { %p2249_p12 = pnand %p2248_p10, %p2242_p8 }
  0x37   : > { %2252 = shalt.err (!%p2249_p12)
}
  0x38   : > { %s2488_s5 = smov 64   ;;  %s2489_s21 = smov 4  }
  0x39   : > { %s3047_s8 = sld [smem:[#allocation35_spill]]  ;;  %s2264_s2 = scalar_lea.vmem %s650_s27, 256 }
  0x3a   : > { %p2265_p13 = scmp.ne.s32.totalorder %s650_s27, %s2264_s2  ;;  %p2272_p5 = scmp.lt.s32.totalorder %s650_s27, %s650_s27 }
  0x3b   : > { %p2273_p8 = scmp.lt.s32.totalorder %s2264_s2, %s2264_s2 }
  0x3c   : > { %p2267_p0 = pnand %p2265_p13, %p2668_p7 }
  0x3d   : > { %p2274_p9 = por %p2273_p8, %p2272_p5 }
  0x3e   : > { %p2268_p2 = pneg %p2267_p0 }
  0x3f   : > { %2074 = dma.hbm_to_vmem [thread:$0]  (!%p2660_p6), %s3047_s8, 256, %s2664_s25, [#allocation10], %s2488_s5, %s2488_s5, %s2489_s21  }
  0x40   : > { %p2275_p11 = pnand %p2274_p9, %p2268_p2 }
  0x42   : > { %2278 = shalt.err (!%p2275_p11)
}
  0x43   : > { %s3048_s12 = sld [smem:[#allocation37_spill]]  ;;  %s2490_s25 = smov [#allocation11]  }
  0x44   : > { %s633_s24 = sshll.u32 %s2490_s25, 4  ;;  %s2491_s6 = smov [#allocation14]   ;;  %s634_s24 = int_to_ptr.vmem [resolvable:$true] %s633_s24 }
  0x45   : > { %s671_s8 = sshll.u32 %s2491_s6, 4  ;;  %s2290_s19 = scalar_lea.vmem %s634_s24, 256  ;;  %s672_s8 = int_to_ptr.vmem [resolvable:$true] %s671_s8 }
  0x46   : > { %p2291_p10 = scmp.ne.s32.totalorder %s634_s24, %s2290_s19  ;;  %p2298_p0 = scmp.lt.s32.totalorder %s634_s24, %s634_s24 }
  0x47   : > { %p2299_p2 = scmp.lt.s32.totalorder %s2290_s19, %s2290_s19 }
  0x48   : > { %p2293_p12 = pnand %p2291_p10, %p2668_p7 }
  0x49   : > { %2080 = dma.hbm_to_vmem [thread:$0]  (!%p2660_p6), %s3048_s12, 256, %s650_s27, [#allocation13], %s2488_s5, %s2488_s5, %s2489_s21  }
  0x4a   : > { %p2294_p13 = pneg %p2293_p12  ;;  %p2300_p5 = por %p2299_p2, %p2298_p0 }
  0x4c   : > { %p2301_p8 = pnand %p2300_p5, %p2294_p13 }
  0x4e   : > { %2304 = shalt.err (!%p2301_p8)
}
  0x4f   : > { %s3049_s10 = sld [smem:[#allocation36_spill]]  ;;  %s2316_s2 = scalar_lea.vmem %s672_s8, 256 }
  0x50   : > { %p2317_p9 = scmp.ne.s32.totalorder %s672_s8, %s2316_s2  ;;  %p2324_p12 = scmp.lt.s32.totalorder %s672_s8, %s672_s8 }
  0x51   : > { %p2325_p0 = scmp.lt.s32.totalorder %s2316_s2, %s2316_s2 }
  0x52   : > { %p2319_p11 = pnand %p2317_p9, %p2668_p7 }
  0x53   : > { %p2326_p13 = por %p2325_p0, %p2324_p12 }
  0x54   : > { %p2320_p10 = pneg %p2319_p11 }
  0x55   : > { %2077 = dma.hbm_to_vmem [thread:$0]  (!%p2660_p6), %s3049_s10, 256, %s634_s24, [#allocation10], %s2488_s5, %s2488_s5, %s2489_s21  }
  0x56   : > { %p2327_p2 = pnand %p2326_p13, %p2320_p10 }
  0x58   : > { %2330 = shalt.err (!%p2327_p2)
}
  0x59   : > { %s3050_s16 = sld [smem:[#allocation38_spill]]  ;;  %s1876_s22 = sadd.s32 4294967294, %s2483_s0  }
  0x5a   : > { %s55_s26 = sadd.s32 1, %s2479_s4  ;;  %s144_s25 = sadd.s32 1, %s2471_s29 }
  0x5b   : > { %p57_p7 = scmp.ge.s32.totalorder %s55_s26, 2  ;;  %p151_p5 = scmp.ne.s32.totalorder %s2471_s29, %s2467_s28 }
  0x5c   : > { %p152_p8 = scmp.eq.s32.totalorder %s2483_s0, 0  ;;  %p157_p9 = scmp.ne.s32.totalorder %s2467_s28, %s2463_s3 }
  0x5d   : > { %s3085_s26 = smov (%p57_p7, %s55_s26), 0  ;;  %p571_p10 = scmp.eq.s32.totalorder %s2646_s23, 1 }
  0x5e   : > { %3051 = sst [smem:[#allocation24_spill]] %s3085_s26  ;;  %p2734_p11 = por %p152_p8, %p151_p5 }
  0x5f   : > { %2083 = dma.hbm_to_vmem [thread:$0]  (!%p2660_p6), %s3050_s16, 256, %s672_s8, [#allocation13], %s2488_s5, %s2488_s5, %s2489_s21  }
  0x60   : > { %p2740_p6 = por %p3024_p1, %p157_p9  ;;  %s141_s5 = ssub.s32 %s2479_s4, %s3085_s26 }
  0x61   : > { %p142_p12 = scmp.eq.s32.totalorder %s141_s5, 0  ;;  %p577_p0 = scmp.eq.s32.totalorder %s1876_s22, 1 }
  0x62   : > { %p2747_p13 = por %p571_p10, %p151_p5  ;;  %p2100_p2 = scmp.lt.s32.totalorder %s2483_s0, 2 }
  0x63   : > { %s2753_s6 = scalar_select %p142_p12, %s2471_s29, %s144_s25  }
  0x64   : > { %p2755_p7 = por %p577_p0, %p157_p9  ;;  %s727_s27 = sand.u32 1, %s2471_s29  }
  0x65   : > { %3055 = sst [smem:[#allocation25_spill]] %s2753_s6  ;;  %s1885_s2 = sshll.u32 %s2479_s4, 4 }
  0x66   : > { %s3056_s7 = scalar_select %p2755_p7, 1, 0 }
  0x67   : > { %s730_s19 = scalar_lea.vmem [#allocation3], %s727_s27  ;;  %s3058_s16 = sld [smem:[#allocation30_spill]] }
  0x68   : > { %3057 = sst [smem:[#allocation26_spill]] %s3056_s7  ;;  %s737_s20 = sshll.u32 %s730_s19, 4  ;;  %s738_s20 = int_to_ptr.vmem [resolvable:$true] %s737_s20 }
  0x69   : > { %p2766_p5 = pnand %p2100_p2, %p2734_p11  ;;  %s3060_s6 = sld [smem:[#allocation32_spill]] }
  0x6a   : > { %s744_s4 = sand.u32 1, %s2483_s0   ;;  %s728_s29 = scalar_lea.sflag [#allocation4], %s727_s27 }
  0x6b   : > { %p2333_p8 = pneg %p2766_p5  ;;  %s2344_s19 = scalar_lea.vmem %s738_s20, 16 }
  0x6c   : > { %p2345_p9 = scmp.ne.s32.totalorder %s738_s20, %s2344_s19  ;;  %s2492_s10 = smov [#allocation3]  }
  0x6d   : > { %s735_s5 = scalar_lea.hbm %s3058_s16, %s1885_s2  ;;  %s2349_s12 = sshll.u32 %s2492_s10, 4  ;;  %s2350_s12 = int_to_ptr.vmem [resolvable:$false] %s2349_s12 }
  0x6e   : > { %p2347_p10 = pnand %p2345_p9, %p2333_p8  ;;  %s2351_s16 = scalar_lea.vmem %s2350_s12, 32 }
  0x6f   : > { %s2773_s7 = scalar_lea.hbm %s3060_s6, %s1885_s2  ;;  %p2352_p12 = scmp.lt.s32.totalorder %s738_s20, %s2350_s12 }
  0x70   : > { %p2348_p11 = pneg %p2347_p10  ;;  %p2353_p0 = scmp.lt.s32.totalorder %s2351_s16, %s2344_s19 }
  0x72   : > { %p2354_p2 = por %p2353_p0, %p2352_p12 }
  0x74   : > { %p2355_p4 = pnand %p2354_p2, %p2348_p11 }
  0x76   : > { %2358 = shalt.err (!%p2355_p4)
}
  0x77   : > { %2087 = dma.hbm_to_vmem [thread:$0]  (!%p2766_p5), %s735_s5, 16, %s738_s20, %s728_s29  }
  0x78   : > { %s747_s26 = scalar_lea.vmem [#allocation6], %s727_s27  ;;  %s745_s6 = scalar_lea.sflag [#allocation7], %s744_s4 }
  0x79   : > { %s754_s24 = sshll.u32 %s747_s26, 4  ;;  %s2493_s25 = smov [#allocation6]   ;;  %s755_s24 = int_to_ptr.vmem [resolvable:$true] %s754_s24 }
  0x7a   : > { %s2372_s2 = scalar_lea.vmem %s755_s24, 16  ;;  %s2377_s10 = sshll.u32 %s2493_s25, 4  ;;  %s2378_s10 = int_to_ptr.vmem [resolvable:$false] %s2377_s10 }
  0x7b   : > { %p2373_p9 = scmp.ne.s32.totalorder %s755_s24, %s2372_s2  ;;  %s2379_s19 = scalar_lea.vmem %s2378_s10, 32 }
  0x7c   : > { %p2380_p11 = scmp.lt.s32.totalorder %s755_s24, %s2378_s10  ;;  %p2381_p4 = scmp.lt.s32.totalorder %s2379_s19, %s2372_s2 }
  0x7d   : > { %p2375_p10 = pnand %p2373_p9, %p2333_p8 }
  0x7e   : > { %p2382_p12 = por %p2381_p4, %p2380_p11 }
  0x7f   : > { %p2376_p1 = pneg %p2375_p10 }
  0x81   : > { %p2383_p0 = pnand %p2382_p12, %p2376_p1 }
  0x83   : > { %2386 = shalt.err (!%p2383_p0)
}
  0x84   : > { %2090 = dma.hbm_to_vmem [thread:$0]  (!%p2766_p5), %s2773_s7, 16, %s755_s24, %s745_s6  }
  0x85   : > { %763 = sbr.rel (%p2651_p3) target bundleno = 2565 (0xa05), region = 108  ;;  %s2792_s29 = sand.u32 (!%p2651_p3), 1, %s2467_s28  }
  0x86   : > { %s766_s4 = scalar_lea.sflag (!%p2651_p3), [#allocation4], %s2792_s29  ;;  %s768_s27 = scalar_lea.vmem (!%p2651_p3), [#allocation3], %s2792_s29 }
  0x8a   : > { %2438 = dma.done.wait (%p2740_p6), %s766_s4, 16  }
  0x8b   : > { %2440 = vsyncadd (%p2740_p6), %s766_s4, 4294967280  ;;  %s773_s7 = sand.u32 1, %s2646_s23   ;;  %s776_s1 = scalar_lea.vmem [#allocation6], %s2792_s29 }
  0x8c   : > { %s774_s20 = scalar_lea.sflag [#allocation7], %s773_s7 }
  0x8d   : > { %2442 = dma.done.wait (%p2740_p6), %s774_s20, 16  }
  0x8e   : > { %2444 = vsyncadd (%p2740_p6), %s774_s20, 4294967280  ;;  %p3061_p1 = scmp.eq.s32.totalorder %s2646_s23, 0 }
  0x90   : > { %2446 = dma.done.wait (%p3061_p1), [#allocation7], 16   ;;  %p3062_p3 = pmov %p3061_p1 }
  0x91   : > { %p3063_p5 = pmov %p3061_p1 }
  0x92   : > { %2448 = vsyncadd (%p3062_p3), [#allocation7], 4294967280 }
  0x93   : > { %2450 = dma.done.wait (%p3063_p5), [#allocation10], 512   ;;  %p3064_p8 = pmov %p3061_p1 }
  0x94   : > { %p3065_p2 = pmov %p3061_p1 }
  0x95   : > { %2452 = vsyncadd (%p3064_p8), [#allocation10], 4294966784 }
  0x96   : > { %2454 = dma.done.wait (%p3065_p2), [#allocation13], 512   ;;  %p3066_p9 = pmov %p3061_p1 }
  0x97   : > { %p882_p6 = scmp.lt.s32.totalorder %s2475_s30, 1  ;;  %v2494_v0 = vmov 0.0   ;;  %vm2495_vm0 = vmmov 0   ;;  %v2169_v1 = vld [vmem:[#allocation9 + $0x8] sm:$0xff]   ;;  %s3067_s12 = sld [smem:[#allocation33_spill]]  ;;  %v2171_v3 = vld [vmem:[#allocation9] sm:$0xff]  }
  0x98   : > { %2456 = vsyncadd (%p3066_p9), [#allocation13], 4294966784  ;;  %1974 = vmatprep.subr.bf16.mxu1 %v2494_v0  ;;  %1966 = vmatprep.subr.bf16.mxu0 %v2494_v0  ;;  %s3068_s24 = sld [smem:[#allocation28_spill]]  ;;  %vm932_vm1 = vcmask 261120   ;;  %v2496_v9 = vmov 0   ;;  %vm1128_vm2 = vcmask 130048  }
  0x99   : > { %1978 = vmatprep.mubr.msk.bf16.mxu1 %vm2495_vm0, %v2494_v0  ;;  %s883_s8 = scalar_select %p882_p6, %s2475_s30, 1  ;;  %1970 = vmatprep.mubr.msk.bf16.mxu0 %vm2495_vm0, %v2494_v0  ;;  %v1901_v11 = vld [vmem:[%s3003_s9] ss:$0 sm:$0xff]  ;;  %v1897_v12 = vld [vmem:[#allocation8] ss:$0 sm:$0xff]  ;;  %vm1185_vm3 = vcmask 64512  }
  0x9a   : > { %s3069_s10 = sld [smem:[#allocation27_spill]]  ;;  %1975 = vmatpush3.bf16.msra.mxu1 %v2169_v1  ;;  %2167 = vset.pattern.permute.xlu1 %v2496_v9  ;;  %v2173_v26 = vld [vmem:[#allocation11 + $0x8] sm:$0xff]   ;;  %v2174_v27 = vld [vmem:[#allocation11] sm:$0xff]   ;;  %vm1201_vm4 = vcmask 1043456   ;;  %vm1368_vm5 = vcmask 261248   ;;  %vm1585_vm6 = vcmask 523264  }
  0x9b   : > { %s1894_s5 = sshll.u32 %s883_s8, 3  ;;  %1976 = vmatprep.subr.bf16.mxu1 %v2494_v0  ;;  %s3070_s23 = sld [smem:[#allocation29_spill]]  ;;  %2168 = vset.pattern.permute.xlu0 %v2496_v9  ;;  %v1909_v31 = vld [vmem:[%s768_s27] ss:$0 sm:$0xff] }
  0x9c   : > { %s3071_s2 = sld [smem:[#allocation31_spill]]  ;;  %v1911_v46 = vld [vmem:[%s776_s1] ss:$0 sm:$0xff]  ;;  %s1893_s8 = sshll.u32 %s2792_s29, 3 }
  0x9d   : > { %v2170_v2 = vld [vmem:[%s3067_s12 + $0x8] sm:$0xff]   ;;  %v2172_v4 = vld [vmem:[%s3067_s12] sm:$0xff]   ;;  %s3072_s20 = sld [smem:[#allocation39_spill]]  ;;  %s881_s27 = scalar_lea.vmem [#allocation15], %s1893_s8 }
  0x9e   : > { %s892_s6 = scalar_lea.vmem %s3068_s24, %s1894_s5  ;;  %1967 = vmatpush3.bf16.msra.mxu0 %v2170_v2  ;;  %1977 = vmatpush3.bf16.msra.mxu1 %v2171_v3  ;;  %v1905_v3 = vld [vmem:[%s3005_s11] ss:$0 sm:$0xff]  ;;  %s3073_s16 = sld [smem:[#allocation40_spill]] }
  0x9f   : > { %1968 = vmatprep.subr.bf16.mxu0 %v2494_v0  ;;  %v906_v5 = vld [vmem:[%s892_s6] sm:$0xff]  ;;  %1990 = vmatprep.subr.bf16.mxu1 %v2494_v0  ;;  %s3074_s24 = sld [smem:[#allocation41_spill]]  ;;  %s1935_s6 = sshll.u32 %s2475_s30, 7 }
  0xa0   : > { %s888_s19 = scalar_lea.vmem %s3069_s10, %s1894_s5  ;;  %v908_v7 = vpack.c.bf16 %v906_v5, %v906_v5  ;;  %s1675_s25 = sshll.u32 %s881_s27, 4  ;;  %s1676_s25 = int_to_ptr.vmem [resolvable:$true] %s1675_s25 }
  0xa1   : > { %v2840_v6 = vld [vmem:[%s888_s19] sm:$0xff]  ;;  %s899_s22 = scalar_lea.vmem %s3070_s23, %s1894_s5  ;;  %s2497_s5 = smov 112  }
  0xa2   : > { %v907_v8 = vpack.c.bf16 %v2840_v6, %v2840_v6  ;;  %1969 = vmatpush3.bf16.msra.mxu0 %v2172_v4  ;;  %1979 = vmatmul.mubr.msk.bf16.vlgmr.msra.gmra.mxu1 %vm932_vm1, %v908_v7  ;;  %v1108_v10 = vld [vmem:[%s899_s22] sm:$0xff]  ;;  %v1914_v53 = vld [vmem:[%s3071_s2 + $0x8] sm:$0xff]  ;;  %s2498_s19 = smov 16   ;;  %s1661_s7 = scalar_lea.sflag [#allocation5], %s2792_s29 }
  0xa3   : > { %1982 = vmatprep.subr.bf16.mxu0 %v2494_v0  ;;  %1992 = vmatprep.mubr.msk.bf16.mxu1 %vm2495_vm0, %v2494_v0  ;;  %v1176_v43 = vld [vmem:[%s3071_s2] sm:$0xff]  ;;  %s2499_s23 = smov [#allocation15]  }
  0xa4   : > { %1111 = vperm.xlu1 %2167, %v1108_v10   ;;  %s2391_s22 = sshll.u32 %s2499_s23, 4  ;;  %s2392_s22 = int_to_ptr.vmem [resolvable:$false] %s2391_s22 }
  0xa5   : > { %1971 = vmatmul.mubr.msk.bf16.vlgmr.msra.gmra.mxu0 %vm932_vm1, %v907_v8  ;;  %s2393_s30 = scalar_lea.vmem %s2392_s22, 256  ;;  %p2394_p12 = scmp.lt.s32.totalorder %s1676_s25, %s2392_s22 }
  0xa6   : > { %1986 = vmatprep.mubr.msk.bf16.mxu0 %vm2495_vm0, %v2494_v0  ;;  %1983 = vmatpush3.bf16.msra.mxu0 %v2173_v26 }
  0xa7   : > { %1984 = vmatprep.subr.bf16.mxu0 %v2494_v0 }
  0xaa   : > { %1985 = vmatpush3.bf16.msra.mxu0 %v2174_v27 }
  0xab   : > { %1996 = vmatprep.subr.bf16.mxu0 %v2494_v0 }
  0xad   : > { %1987 = vmatmul.mubr.msk.bf16.vlgmr.msra.gmra.mxu0 %vm932_vm1, %v908_v7 }
  0xae   : > { %1998 = vmatprep.mubr.msk.bf16.mxu0 %vm2495_vm0, %v2494_v0 }
 0x11f   : > { %v1112_v32 = vpop.permute.xlu1 %1111 }
 0x120   : > { %v1117_v33 = vsub.s32 %v1112_v32, %v1909_v31  ;;  %v2175_v31 = vld [vmem:[#allocation12 + $0x8] sm:$0xff]   ;;  %v2176_v32 = vld [vmem:[#allocation12] sm:$0xff]  }
 0x122   : > { %v1118_v34 = vcvt.s32.f32 %v1117_v33 }
 0x124   : > { %v1119_v35 = vmul.f32 1.6666667e-05, %v1118_v34 }
 0x126   : > { %v1120_v36 = vmax.f32 %v1119_v35, 0.0 }
 0x128   : > { %v1121_v37 = vadd.f32 1.0, %v1120_v36 }
 0x12a   : > { %2183 = vrcp.f32 %v1121_v37 }
 0x137   : > { %v2184_v38 = vpop.eup %2183 }
 0x138   : > { %v1124_v39 = vsub.f32 4.0, %v2184_v38 }
 0x13a   : > { %v1125_v40 = vadd.f32 1.0, %v1124_v39 }
 0x13c   : > { %2185 = vrcp.f32 %v1125_v40  ;;  %v1916_v40 = vld [vmem:[%s3007_s13] ss:$0 sm:$0xff] }
 0x149   : > { %v2186_v41 = vpop.eup %2185 }
 0x162   : > { %v1036_v13 = vpop.f32.mrf.mxu1 }
 0x163   : > { %v1037_v14 = vadd.f32 %v1901_v11, %v1036_v13 }
 0x164   : > { %v1980_v16 = vpop.f32.mrf.mxu1 }
 0x165   : > { %v970_v15 = vpop.f32.mrf.mxu0  ;;  %v1106_v18 = vpack.c.bf16 %v1037_v14, %v1037_v14 }
 0x166   : > { %v971_v17 = vadd.f32 %v1897_v12, %v970_v15  ;;  %v1039_v20 = vpop.f32.mrf.mxu1 }
 0x167   : > { %v1972_v19 = vpop.f32.mrf.mxu0  ;;  %v1133_v21 = vsel %vm1128_vm2, %v1106_v18, 0  ;;  %1250 = vrot.lane.b32.xlu0 %v1106_v18, %s2497_s5 }
 0x168   : > { %v1105_v22 = vpack.c.bf16 %v971_v17, %v971_v17  ;;  %v1981_v24 = vpop.f32.mrf.mxu1  ;;  %1991 = vmatpush3.bf16.xpose.msra.mxu1 %v1133_v21 }
 0x169   : > { %v973_v23 = vpop.f32.mrf.mxu0  ;;  %2002 = vmatprep.subr.bf16.mxu1 %v2494_v0 }
 0x16b   : > { %v1973_v25 = vpop.f32.mrf.mxu0  ;;  %1247 = vrot.lane.b32.xlu0 %v1105_v22, %s2497_s5 }
 0x16d   : > { %v1099_v4 = vpop.f32.mrf.mxu0 }
 0x16e   : > { %v1100_v5 = vadd.f32 %v1905_v3, %v1099_v4  ;;  %v2181_v3 = vld [vmem:[%s3012_s18 + $0x8] sm:$0xff]   ;;  %v2182_v4 = vld [vmem:[%s3012_s18] sm:$0xff]  }
 0x16f   : > { %1993 = vmatmul.mubr.msk.bf16.vlgmr.msra.gmra.mxu1 %vm1128_vm2, %v1105_v22  ;;  %v1988_v7 = vpop.f32.mrf.mxu0 }
 0x170   : > { %2004 = vmatprep.mubr.msk.bf16.mxu1 %vm2495_vm0, %v2494_v0  ;;  %v1107_v8 = vpack.c.bf16 %v1100_v5, %v1100_v5  ;;  %v1922_v5 = vld [vmem:[%s3011_s17] ss:$0 sm:$0xff] }
 0x171   : > { %v1102_v9 = vpop.f32.mrf.mxu0 }
 0x172   : > { %v1203_v10 = vsel %vm1201_vm4, %v1107_v8, 0 }
 0x173   : > { %v1989_v11 = vpop.f32.mrf.mxu0  ;;  %1997 = vmatpush3.bf16.msra.mxu0 %v1203_v10 }
 0x174   : > { %2008 = vmatprep.subr.bf16.mxu0 %v2494_v0 }
 0x1d9   : > { %v1251_v28 = vpop.permute.xlu0 %1250 }
 0x1da   : > { %v1256_v29 = vsel %vm1128_vm2, %v1251_v28, 0 }
 0x1db   : > { %2003 = vmatpush3.bf16.xpose.msra.mxu1 %v1256_v29 }
 0x1dc   : > { %2014 = vmatprep.subr.bf16.mxu1 %v2494_v0 }
 0x1dd   : > { %v1248_v30 = vpop.permute.xlu0 %1247 }
 0x1e2   : > { %2005 = vmatmul.mubr.msk.bf16.vlgmr.msra.gmra.mxu1 %vm1128_vm2, %v1248_v30 }
 0x1e3   : > { %2018 = vmatprep.mubr.msk.bf16.mxu1 %vm2495_vm0, %v2494_v0  ;;  %2015 = vmatpush3.bf16.msra.mxu1 %v2175_v31 }
 0x1e4   : > { %2016 = vmatprep.subr.bf16.mxu1 %v2494_v0 }
 0x1e7   : > { %2017 = vmatpush3.bf16.msra.mxu1 %v2176_v32 }
 0x1e8   : > { %2030 = vmatprep.subr.bf16.mxu1 %v2494_v0 }
 0x22f   : > { %v1169_v42 = vpop.f32.mrf.mxu1 }
 0x230   : > { %v1175_v44 = vmul.f32 %v2186_v41, %v1169_v42 }
 0x231   : > { %v1994_v45 = vpop.f32.mrf.mxu1 }
 0x232   : > { %v1177_v47 = vadd.f32 %v1176_v43, %v1175_v44 }
 0x233   : > { %v1172_v48 = vpop.f32.mrf.mxu1 }
 0x234   : > { %v1184_v49 = vadd.f32 %v1911_v46, %v1177_v47 }
 0x235   : > { %v1995_v50 = vpop.f32.mrf.mxu1 }
 0x236   : > { %v1186_v51 = vsel %vm1185_vm3, %v1184_v49, -inf }
 0x237   : > { %1187 = vmax.xlane.f32.xlu1 %v1186_v51 }
 0x2a2   : > { %v1292_v52 = vpop.f32.mrf.mxu1 }
 0x2a3   : > { %v1298_v54 = vmul.f32 %v2186_v41, %v1292_v52 }
 0x2a4   : > { %v2006_v55 = vpop.f32.mrf.mxu1 }
 0x2a5   : > { %v1301_v56 = vadd.f32 %v1914_v53, %v1298_v54  ;;  %v2177_v53 = vld [vmem:[#allocation14 + $0x8] sm:$0xff]   ;;  %v2178_v54 = vld [vmem:[#allocation14] sm:$0xff]  }
 0x2a6   : > { %v1295_v57 = vpop.f32.mrf.mxu1 }
 0x2a7   : > { %v1302_v58 = vadd.f32 %v1911_v46, %v1301_v56 }
 0x2a8   : > { %v2007_v59 = vpop.f32.mrf.mxu1 }
 0x2a9   : > { %v1303_v60 = vsel %vm1185_vm3, %v1302_v58, -inf }
 0x2aa   : > { %1304 = vmax.xlane.f32.xlu0 %v1303_v60  ;;  %v1921_v60 = vld [vmem:[%s3009_s15] ss:$0 sm:$0xff] }
 0x2c0   : > { %v1188_v61 = vpop.xlane.xlu1 %1187 }
 0x2c1   : > { %v1189_v62 = vsub.f32 %v1184_v49, %v1188_v61 }
 0x2c3   : > { %v1190_v63 = vmul.f32 1.442695, %v1189_v62 }
 0x2c5   : > { %2187 = vpow2.f32 %v1190_v63 }
 0x2d2   : > { %v2188_v1 = vpop.eup %2187 }
 0x2d3   : > { %v1192_v2 = vsel %vm1185_vm3, %v2188_v1, 0.0 }
 0x2d4   : > { %1193 = vadd.xlane.f32.xlu0 %v1192_v2  ;;  %v2180_v2 = vld [vmem:[%s3012_s18 + $0x10] sm:$0xff]  }
 0x2ea   : > { %1316 = vrot.lane.b32.xlu0 %v1107_v8, %s2497_s5 }
 0x333   : > { %v1305_v12 = vpop.xlane.xlu0 %1304 }
 0x334   : > { %v1306_v13 = vsub.f32 %v1302_v58, %v1305_v12  ;;  %v1920_v58 = vld [vmem:[%s3008_s14] ss:$0 sm:$0xff] }
 0x336   : > { %v1307_v14 = vmul.f32 1.442695, %v1306_v13 }
 0x338   : > { %2189 = vpow2.f32 %v1307_v14 }
 0x345   : > { %v2190_v15 = vpop.eup %2189 }
 0x346   : > { %v1309_v16 = vsel %vm1185_vm3, %v2190_v15, 0.0 }
 0x347   : > { %1310 = vadd.xlane.f32.xlu1 %v1309_v16 }
 0x35d   : > { %v1194_v17 = vpop.xlane.xlu0 %1193 }
 0x35e   : > { %2191 = vrcp.f32 %v1194_v17 }
 0x361   : > { %v1317_v19 = vpop.permute.xlu0 %1316 }
 0x362   : > { %v1322_v22 = vsel %vm1201_vm4, %v1317_v19, 0 }
 0x36b   : > { %v2192_v18 = vpop.eup %2191 }
 0x36c   : > { %v1196_v20 = vmul.f32 %v2192_v18, %v2188_v1  ;;  %v2179_v1 = vld [vmem:[%s3012_s18 + $0x18] sm:$0xff]  }
 0x36e   : > { %v1197_v21 = vpack.c.bf16 %v1196_v20, %v1196_v20 }
 0x370   : > { %1999 = vmatmul.mubr.msk.bf16.vlgmr.msra.gmra.mxu0 %vm1185_vm3, %v1197_v21  ;;  %v1926_v21 = vld [vmem:[%s3072_s20] ss:$0 sm:$0xff]  ;;  %s2387_s20 = scalar_lea.vmem %s1676_s25, 128 }
 0x371   : > { %2009 = vmatpush3.bf16.msra.mxu0 %v1322_v22  ;;  %2010 = vmatprep.mubr.msk.bf16.mxu0 %vm2495_vm0, %v2494_v0  ;;  %p2388_p10 = scmp.ne.s32.totalorder %s1676_s25, %s2387_s20  ;;  %p2395_p0 = scmp.lt.s32.totalorder %s2393_s30, %s2387_s20 }
 0x372   : > { %2022 = vmatprep.subr.bf16.mxu0 %v2494_v0 }
 0x373   : > { %p2389_p11 = pnand %p2388_p10, %p2747_p13  ;;  %p2396_p1 = por %p2395_p0, %p2394_p12 }
 0x375   : > { %p2390_p4 = pneg %p2389_p11 }
 0x377   : > { %p2397_p3 = pnand %p2396_p1, %p2390_p4 }
 0x3d0   : > { %v1311_v23 = vpop.xlane.xlu1 %1310 }
 0x3d1   : > { %2193 = vrcp.f32 %v1311_v23 }
 0x3de   : > { %v2194_v24 = vpop.eup %2193 }
 0x3df   : > { %v1313_v25 = vmul.f32 %v2194_v24, %v2190_v15 }
 0x3e1   : > { %v1314_v26 = vpack.c.bf16 %v1313_v25, %v1313_v25 }
 0x3e3   : > { %2011 = vmatmul.mubr.msk.bf16.vlgmr.msra.gmra.mxu0 %vm1185_vm3, %v1314_v26 }
 0x3e4   : > { %2026 = vmatprep.mubr.msk.bf16.mxu0 %vm2495_vm0, %v2494_v0  ;;  %2023 = vmatpush3.bf16.msra.mxu0 %v2177_v53 }
 0x3e5   : > { %2024 = vmatprep.subr.bf16.mxu0 %v2494_v0 }
 0x3e8   : > { %2025 = vmatpush3.bf16.msra.mxu0 %v2178_v54 }
 0x430   : > { %v1239_v27 = vpop.f32.mrf.mxu0 }
 0x431   : > { %1245 = vst.msk [vmem:[#allocation2] sm:$0xff] %vm1128_vm2, %v1239_v27 }
 0x432   : > { %v2000_v28 = vpop.f32.mrf.mxu0 }
 0x434   : > { %v1242_v29 = vpop.f32.mrf.mxu0 }
 0x436   : > { %v2001_v30 = vpop.f32.mrf.mxu0 }
 0x4a3   : > { %v1358_v33 = vpop.f32.mrf.mxu0 }
 0x4a4   : > { %1365 = vrot.lane.b32.xlu1 %v1358_v33, %s2498_s19  ;;  %s3075_s19 = sld [smem:[#allocation42_spill]] }
 0x4a5   : > { %v2012_v34 = vpop.f32.mrf.mxu0 }
 0x4a7   : > { %v1361_v35 = vpop.f32.mrf.mxu0 }
 0x4a9   : > { %v2013_v36 = vpop.f32.mrf.mxu0 }
 0x4aa   : > { %s1673_s4 = scalar_lea.hbm %s3075_s19, %s1935_s6 }
 0x516   : > { %v1366_v37 = vpop.permute.xlu1 %1365 }
 0x517   : > { %1369 = vst.msk [vmem:[#allocation2] sm:$0xff] %vm1368_vm5, %v1366_v37 }
 0x51e   : > { %v1370_v38 = vld [vmem:[#allocation2] sm:$0xff] }
 0x51f   : > { %v1371_v39 = vpack.c.bf16 %v1370_v38, %v1370_v38  ;;  %v1932_v38 = vld [vmem:[%s3073_s16] ss:$0 sm:$0xff] }
 0x521   : > { %2019 = vmatmul.mubr.msk.bf16.vlgmr.msra.gmra.mxu1 %vm932_vm1, %v1371_v39 }
 0x522   : > { %2038 = vmatprep.mubr.msk.bf16.mxu1 %vm2495_vm0, %v2494_v0  ;;  %2031 = vmatpush3.bf16.msra.mxu1 %v2179_v1 }
 0x523   : > { %2032 = vmatprep.subr.bf16.mxu1 %v2494_v0 }
 0x526   : > { %2033 = vmatpush3.bf16.msra.mxu1 %v2180_v2 }
 0x527   : > { %2034 = vmatprep.subr.bf16.mxu1 %v2494_v0 }
 0x52a   : > { %2035 = vmatpush3.bf16.msra.mxu1 %v2181_v3 }
 0x52b   : > { %2036 = vmatprep.subr.bf16.mxu1 %v2494_v0 }
 0x52e   : > { %2037 = vmatpush3.bf16.msra.mxu1 %v2182_v4 }
 0x5e1   : > { %v1432_v41 = vpop.f32.mrf.mxu1 }
 0x5e2   : > { %v1433_v42 = vadd.f32 %v1916_v40, %v1432_v41  ;;  %v1933_v40 = vld [vmem:[%s3074_s24] ss:$0 sm:$0xff] }
 0x5e3   : > { %v2020_v43 = vpop.f32.mrf.mxu1 }
 0x5e4   : > { %v1438_v44 = vadd.f32 %v1433_v42, %v2840_v6 }
 0x5e5   : > { %v1435_v45 = vpop.f32.mrf.mxu1 }
 0x5e6   : > { %v1441_v46 = vsel %vm932_vm1, %v1438_v44, 0.0 }
 0x5e7   : > { %1442 = vadd.xlane.f32.xlu1 %v1441_v46  ;;  %v2021_v47 = vpop.f32.mrf.mxu1 }
 0x670   : > { %v1443_v48 = vpop.xlane.xlu1 %1442 }
 0x671   : > { %v1445_v49 = vmul.f32 0.03125, %v1443_v48 }
 0x673   : > { %v1446_v50 = vsub.f32 %v1438_v44, %v1445_v49 }
 0x675   : > { %v1447_v51 = vmul.f32 %v1446_v50, %v1446_v50 }
 0x677   : > { %v1448_v52 = vsel %vm932_vm1, %v1447_v51, 0.0 }
 0x678   : > { %1449 = vadd.xlane.f32.xlu0 %v1448_v52 }
 0x701   : > { %v1450_v55 = vpop.xlane.xlu0 %1449 }
 0x702   : > { %v1451_v6 = vmul.f32 0.03125, %v1450_v55 }
 0x704   : > { %v1452_v56 = vadd.f32 1e-12, %v1451_v6 }
 0x706   : > { %2195 = vrsqrt.f32 %v1452_v56 }
 0x713   : > { %v2196_v57 = vpop.eup %2195 }
 0x714   : > { %v1454_v59 = vmul.f32 %v2196_v57, %v1446_v50 }
 0x716   : > { %v1461_v61 = vmul.f32 %v1920_v58, %v1454_v59 }
 0x718   : > { %v1468_v62 = vadd.f32 %v1921_v60, %v1461_v61 }
 0x71a   : > { %v1469_v63 = vpack.c.bf16 %v1468_v62, %v1468_v62 }
 0x71c   : > { %2027 = vmatmul.mubr.msk.bf16.vlgmr.msra.gmra.mxu0 %vm932_vm1, %v1469_v63 }
 0x7dc   : > { %v1530_v7 = vpop.f32.mrf.mxu0 }
 0x7dd   : > { %v1531_v8 = vadd.f32 %v1922_v5, %v1530_v7 }
 0x7de   : > { %v2028_v9 = vpop.f32.mrf.mxu0 }
 0x7df   : > { %v1536_v10 = vmul.f32 %v1531_v8, %v1531_v8 }
 0x7e0   : > { %v1533_v11 = vpop.f32.mrf.mxu0 }
 0x7e1   : > { %v1537_v12 = vmul.f32 %v1536_v10, %v1531_v8 }
 0x7e2   : > { %v2029_v13 = vpop.f32.mrf.mxu0 }
 0x7e3   : > { %v1538_v14 = vmul.f32 0.044715, %v1537_v12 }
 0x7e5   : > { %v1539_v15 = vadd.f32 %v1538_v14, %v1531_v8 }
 0x7e7   : > { %v1540_v16 = vmul.f32 0.7978846, %v1539_v15 }
 0x7e9   : > { %2197 = vtanh.f32 %v1540_v16 }
 0x7f6   : > { %v2198_v0 = vpop.eup %2197 }
 0x7f7   : > { %v1542_v17 = vadd.f32 1.0, %v2198_v0 }
 0x7f9   : > { %v1543_v18 = vmul.f32 0.5, %v1542_v17 }
 0x7fb   : > { %v1544_v19 = vmul.f32 %v1543_v18, %v1531_v8 }
 0x7fd   : > { %v1545_v20 = vpack.c.bf16 %v1544_v19, %v1544_v19 }
 0x7ff   : > { %2039 = vmatmul.mubr.msk.bf16.vlgmr.msra.gmra.mxu1 %vm1585_vm6, %v1545_v20 }
 0x8bf   : > { %v1623_v22 = vpop.f32.mrf.mxu1 }
 0x8c0   : > { %v1624_v23 = vadd.f32 %v1926_v21, %v1623_v22 }
 0x8c1   : > { %v2040_v24 = vpop.f32.mrf.mxu1 }
 0x8c2   : > { %v1629_v25 = vadd.f32 %v1624_v23, %v1468_v62 }
 0x8c3   : > { %v1626_v26 = vpop.f32.mrf.mxu1 }
 0x8c4   : > { %v1632_v27 = vsel %vm932_vm1, %v1629_v25, 0.0 }
 0x8c5   : > { %1633 = vadd.xlane.f32.xlu0 %v1632_v27  ;;  %v2041_v28 = vpop.f32.mrf.mxu1 }
 0x94e   : > { %v1634_v29 = vpop.xlane.xlu0 %1633 }
 0x94f   : > { %v1635_v30 = vmul.f32 0.03125, %v1634_v29 }
 0x951   : > { %v1636_v31 = vsub.f32 %v1629_v25, %v1635_v30 }
 0x953   : > { %v1637_v32 = vmul.f32 %v1636_v31, %v1636_v31 }
 0x955   : > { %v1638_v33 = vsel %vm932_vm1, %v1637_v32, 0.0 }
 0x956   : > { %1639 = vadd.xlane.f32.xlu1 %v1638_v33 }
 0x9df   : > { %v1640_v34 = vpop.xlane.xlu1 %1639 }
 0x9e0   : > { %v1641_v35 = vmul.f32 0.03125, %v1640_v34 }
 0x9e2   : > { %v1642_v36 = vadd.f32 1e-12, %v1641_v35 }
 0x9e4   : > { %2199 = vrsqrt.f32 %v1642_v36 }
 0x9f1   : > { %v2200_v37 = vpop.eup %2199 }
 0x9f2   : > { %v1644_v39 = vmul.f32 %v2200_v37, %v1636_v31 }
 0x9f4   : > { %v1651_v41 = vmul.f32 %v1932_v38, %v1644_v39 }
 0x9f6   : > { %v1658_v42 = vadd.f32 %v1933_v40, %v1651_v41 }
 0x9f8   : > { %1659 = vst.msk [vmem:[%s881_s27] sm:$0xff] %vm932_vm1, %v1658_v42 }
 0x9f9   : > { %2400 = shalt.err (!%p2397_p3)
}
 0x9fa   : > { %s2401_s8 = scalar_lea.hbm %s1673_s4, 128  ;;  %s2405_s26 = scalar_lea.hbm %s3075_s19, 256 }
 0x9fb   : > { %p2402_p5 = scmp.ne.s32.totalorder %s1673_s4, %s2401_s8  ;;  %p2406_p9 = scmp.lt.s32.totalorder %s1673_s4, %s3075_s19 }
 0x9fc   : > { %p2407_p6 = scmp.lt.s32.totalorder %s2405_s26, %s2401_s8 }
 0x9fd   : > { %p2403_p8 = pnand %p2402_p5, %p2747_p13 }
 0x9fe   : > { %p2408_p10 = por %p2407_p6, %p2406_p9 }
 0x9ff   : > { %p2404_p2 = pneg %p2403_p8 }
 0xa01   : > { %p2409_p11 = pnand %p2408_p10, %p2404_p2 }
 0xa03   : > { %2412 = shalt.err (!%p2409_p11)
}
 0xa04   : > { %2066 = dma.vmem_to_hbm [thread:$0]  (%p2747_p13), %s1676_s25, 128, %s1673_s4, %s1661_s7  }
 0xa05 PF: > { %s1687_s27 = sand.u32 1, %s2463_s3   ;;  %p3077_p4 = scmp.ge.s32.totalorder %s2483_s0, 2 }
 0xa06   : > { %s1688_s1 = scalar_lea.sflag [#allocation5], %s1687_s27 }
 0xa07   : > { %p2092_p12 = pnand %p3077_p4, %p2755_p7 }
 0xa09   : > { %p2093_p0 = pneg %p2092_p12 }
 0xa0b   : > { %2458 = dma.done.wait (%p2093_p0), %s1688_s1, 128  }
 0xa0c   : > { %2460 = vsyncadd (%p2093_p0), %s1688_s1, 4294967168  ;;  %s43_s0 = sadd.s32 1, %s2483_s0   ;;  %s3078_s10 = sld [smem:[#allocation22_spill]] }
 0xa0d   : > { %p40_p1 = scmp.ge.s32.totalorder %s43_s0, 4   ;;  %s3079_s29 = sld [smem:[#allocation25_spill]] }
 0xa0e   : > { %s3080_s30 = sld [smem:[#allocation23_spill]]  ;;  %s3082_s3 = smov %s2467_s28 }
 0xa0f   : > { %s3081_s4 = sld [smem:[#allocation24_spill]]  ;;  %42 = sbr.rel (!%p40_p1) target bundleno = 27 (0x1b), region = 199 }
 0xa12   : > { %s3083_s28 = smov %s3078_s10 }
 0xa14   :  { %1693 = vsyncpa [#allocation4], 1 }
 0xa15   :  { %1695 = vsyncpa [#allocation4 + $0x1], 1 }
 0xa16   :  { %1696 = vsyncpa [#allocation7], 1 }
 0xa17   :  { %1698 = vsyncpa [#allocation7 + $0x1], 1 }
 0xa18   :  { %1699 = vsyncpa [#allocation10], 1 }
 0xa19   :  { %1700 = vsyncpa [#allocation13], 1 }
 0xa1a   :  { %1701 = vsyncpa [#allocation5], 1 }
 0xa1b   :  { %1703 = vsyncpa [#allocation5 + $0x1], 1 }

</bundles_post_ra>
